<compile_context>
chip_gen: v7x
topology: tpu7x:2x2x1
jax: 0.10.0
libtpu: 0.0.40
codegen_flags: <defaults>
</compile_context>

<pallas_src>
import functools

import jax
import jax.numpy as jnp
from jax.experimental import pallas as pl
from jax.experimental.pallas import tpu as pltpu


# ----------------------------- kernel helpers -------------------------------

def _conv_bn_relu_pool(h, w_flat, scale, shift, pad):
    """Conv1d(no bias, stride 1) + BatchNorm(eval) + ReLU + MaxPool1d(2,2,1).

    h:      (B, L, C_in)     NLC activations (f32 value, VMEM/vreg-resident)
    w_flat: (K*C_in, C_out)  conv taps flattened in (k, c) row order (bf16)
    scale:  (1, C_out)       gamma / sqrt(var + eps)          (f32)
    shift:  (1, C_out)       beta - mean * scale              (f32)
    """
    B, L, C_in = h.shape
    KC, C_out = w_flat.shape
    K = KC // C_in

    # Conv zero padding along the length (sublane) axis, in-kernel.
    zp = jnp.zeros((B, pad, C_in), jnp.float32)
    hp = jnp.concatenate([zp, h, zp], axis=1)                 # (B, L+2p, C_in)
    L_conv = L + 2 * pad - K + 1

    # im2col: concatenate the K shifted views along the lane axis -> one
    # MXU dot with a K*C_in contraction.  Operands in bf16, f32 accumulate.
    cols = jnp.concatenate([hp[:, k:k + L_conv, :] for k in range(K)], axis=-1)
    y = jnp.dot(cols.reshape(B * L_conv, KC).astype(jnp.bfloat16), w_flat,
                preferred_element_type=jnp.float32)

    # Fused inference BatchNorm + ReLU (f32 on the VPU).
    y = jnp.maximum(y * scale + shift, 0.0).reshape(B, L_conv, C_out)

    # MaxPool1d(kernel=2, stride=2, padding=1).
    # NOTE: y >= 0 after ReLU, so zero pool-padding is equivalent to torch's
    # -inf padding; this pooling MUST stay after the ReLU.
    L_pool = L_conv // 2 + 1
    tail = 1 - (L_conv & 1)                                   # 1 iff L_conv even
    n_pairs = L_pool - 1 - tail
    parts = [y[:, :1, :]]                                     # window 0 = y[0]
    if n_pairs:
        pairs = y[:, 1:1 + 2 * n_pairs, :].reshape(B, n_pairs, 2, C_out)
        parts.append(pairs.max(axis=2))                       # interior windows
    if tail:
        parts.append(y[:, L_conv - 1:L_conv, :])              # last window = y[-1]
    return jnp.concatenate(parts, axis=1)                     # (B, L_pool, C_out)


# ------------------------------ fused kernel --------------------------------

def _fused_forward_kernel(x_ref, w1_ref, s1_ref, sh1_ref,
                          w2_ref, s2_ref, sh2_ref,
                          w3_ref, s3_ref, sh3_ref,
                          wl_ref, bl_ref,
                          logits_ref, feat_ref, *, pads):
    h = x_ref[...]                                            # (Bt, L, C_in) NLC f32

    h = _conv_bn_relu_pool(h, w1_ref[...], s1_ref[...], sh1_ref[...], pads[0])
    # Dropout(configs.dropout) is identity in eval / inference.
    h = _conv_bn_relu_pool(h, w2_ref[...], s2_ref[...], sh2_ref[...], pads[1])
    h = _conv_bn_relu_pool(h, w3_ref[...], s3_ref[...], sh3_ref[...], pads[2])

    Bt, L3, C3 = h.shape
    # Feature output in lane-dense NLC (C3 on the lane axis); wrapper
    # transposes back to PyTorch NCL.
    feat_ref[...] = h

    # Linear head: one MXU dot over the flattened (l, c) feature vector.
    # wl_ref rows are pre-arranged host-side so row index = l*C3 + c matches
    # this flatten order.
    h_flat = jnp.concatenate([h[:, l, :] for l in range(L3)], axis=-1)  # (Bt, L3*C3)
    logits_ref[...] = (jnp.dot(h_flat.astype(jnp.bfloat16), wl_ref[...],
                               preferred_element_type=jnp.float32)
                       + bl_ref[...])


# -------------------------------- wrapper ------------------------------------

def base_model_forward(x_ncl, params, kernel_size, stride, *, batch_tile=64):
    """Fused Pallas forward of base_Model (eval).  Returns (logits, features)."""
    assert stride == 1  # TODO(synk): conv stride > 1 would need strided im2col row selection.
    B, C_in, L = x_ncl.shape
    w1, w2, w3 = params["w1"], params["w2"], params["w3"]
    K1, _, C1 = w1.shape
    K2, _, C2 = w2.shape
    K3, _, C3 = w3.shape
    # NOTE: conv2/conv3 are hard-wired to kernel=8 / padding=4 in the module.
    pads = (kernel_size // 2, 4, 4)

    def pooled_len(length, k, pad):
        return (length + 2 * pad - k + 1) // 2 + 1

    L1 = pooled_len(L, K1, pads[0])
    L2 = pooled_len(L1, K2, pads[1])
    L3 = pooled_len(L2, K3, pads[2])
    num_classes = params["bl"].shape[-1]

    # Conv weights flattened (K, C_in, C_out) -> (K*C_in, C_out), cast to bf16
    # host-side (MXU operands; accumulation stays f32 in-kernel).
    w1f = w1.reshape(K1 * C_in, C1).astype(jnp.bfloat16)
    w2f = w2.reshape(K2 * C1, C2).astype(jnp.bfloat16)
    w3f = w3.reshape(K3 * C2, C3).astype(jnp.bfloat16)
    # Permute the linear weight from torch's (c*L3 + l) row order to the
    # kernel's (l*C3 + c) flatten order (tiny params-only op).
    wlf = (params["wl"].reshape(C3, L3, num_classes).transpose(1, 0, 2)
           .reshape(L3 * C3, num_classes).astype(jnp.bfloat16))

    # NCL -> NLC host-side; fuses into the surrounding XLA graph.
    x_nlc = jnp.transpose(x_ncl, (0, 2, 1)).astype(jnp.float32)

    # Batch tile: largest divisor of B not exceeding batch_tile.
    bt = max(1, min(B, batch_tile))
    while B % bt:
        bt -= 1
    grid = (B // bt,)

    def batched(shape):
        nd = len(shape)
        return pl.BlockSpec(shape, lambda b, nd=nd: (b,) + (0,) * (nd - 1))

    def replicated(shape):
        nd = len(shape)
        return pl.BlockSpec(shape, lambda b, nd=nd: (0,) * nd)

    # Advisory cost estimate so XLA can overlap this tiny custom call.
    Lc1 = L + 2 * pads[0] - K1 + 1
    Lc2 = L1 + 2 * pads[1] - K2 + 1
    Lc3 = L2 + 2 * pads[2] - K3 + 1
    flops = 2 * B * (Lc1 * K1 * C_in * C1 + Lc2 * K2 * C1 * C2
                     + Lc3 * K3 * C2 * C3 + L3 * C3 * num_classes)
    bytes_accessed = (x_nlc.size * 4
                      + (w1f.size + w2f.size + w3f.size + wlf.size) * 2
                      + (params["s1"].size + params["sh1"].size
                         + params["s2"].size + params["sh2"].size
                         + params["s3"].size + params["sh3"].size
                         + params["bl"].size) * 4
                      + B * num_classes * 4 + B * L3 * C3 * 4)
    cost = pl.CostEstimate(flops=flops, transcendentals=0,
                           bytes_accessed=bytes_accessed)

    kern = functools.partial(_fused_forward_kernel, pads=pads)
    logits, feats_nlc = pl.pallas_call(
        kern,
        out_shape=(jax.ShapeDtypeStruct((B, num_classes), jnp.float32),
                   jax.ShapeDtypeStruct((B, L3, C3), jnp.float32)),
        grid=grid,
        in_specs=[
            batched((bt, L, C_in)),
            replicated((K1 * C_in, C1)), replicated((1, C1)), replicated((1, C1)),
            replicated((K2 * C1, C2)), replicated((1, C2)), replicated((1, C2)),
            replicated((K3 * C2, C3)), replicated((1, C3)), replicated((1, C3)),
            replicated((L3 * C3, num_classes)), replicated((1, num_classes)),
        ],
        out_specs=(batched((bt, num_classes)), batched((bt, L3, C3))),
        compiler_params=pltpu.CompilerParams(
            dimension_semantics=("parallel",)),
        cost_estimate=cost,
    )(x_nlc, w1f, params["s1"], params["sh1"],
      w2f, params["s2"], params["sh2"],
      w3f, params["s3"], params["sh3"],
      wlf, params["bl"])

    # PyTorch returns the feature map in NCL layout.
    feats_ncl = jnp.transpose(feats_nlc, (0, 2, 1))
    return logits, feats_ncl


# --------------------------- pure-JAX reference ------------------------------

def _ref_conv_block(x_nlc, w, scale, shift, pad):
    B, L, C_in = x_nlc.shape
    K, _, C_out = w.shape
    xp = jnp.pad(x_nlc, ((0, 0), (pad, pad), (0, 0)))
    L_conv = xp.shape[1] - K + 1
    acc = jnp.zeros((B, L_conv, C_out), jnp.float32)
    for k in range(K):
        acc = acc + jnp.einsum("blc,co->blo", xp[:, k:k + L_conv, :], w[k])
    y = jnp.maximum(acc * scale[None] + shift[None], 0.0)
    L_pool = L_conv // 2 + 1
    ypad = jnp.pad(y, ((0, 0), (1, 2 * L_pool - L_conv - 1), (0, 0)),
                   constant_values=-jnp.inf)
    return ypad.reshape(B, L_pool, 2, C_out).max(axis=2)


def _ref_forward(x_ncl, params, kernel_size):
    x = jnp.transpose(x_ncl, (0, 2, 1))
    x = _ref_conv_block(x, params["w1"], params["s1"], params["sh1"],
                        kernel_size // 2)
    x = _ref_conv_block(x, params["w2"], params["s2"], params["sh2"], 4)
    x = _ref_conv_block(x, params["w3"], params["s3"], params["sh3"], 4)
    x_ncl_out = jnp.transpose(x, (0, 2, 1))
    x_flat = x_ncl_out.reshape(x_ncl_out.shape[0], -1)
    logits = x_flat @ params["wl"] + params["bl"]
    return logits, x_ncl_out


# ------------------------------ param setup ----------------------------------

def make_bn_scale_shift(key, c, eps=1e-5):
    k1, k2, k3, k4 = jax.random.split(key, 4)
    gamma = 1.0 + 0.1 * jax.random.normal(k1, (c,), jnp.float32)
    beta = 0.1 * jax.random.normal(k2, (c,), jnp.float32)
    mean = 0.1 * jax.random.normal(k3, (c,), jnp.float32)
    var = 1.0 + 0.1 * jnp.abs(jax.random.normal(k4, (c,), jnp.float32))
    scale = gamma / jnp.sqrt(var + eps)
    shift = beta - mean * scale
    return scale.reshape(1, c), shift.reshape(1, c)


if __name__ == "__main__":
    # configs (small, consistent with the module):
    input_channels = 4
    kernel_size = 8
    stride = 1
    final_out_channels = 16
    num_classes = 5
    seq_len = 16
    batch = 2
    # length trace: 16 --conv(k8,p4)--> 17 --pool--> 9 --conv--> 10 --pool--> 6
    #               --conv--> 7 --pool--> 4  => features_len = 4
    features_len = 4

    key = jax.random.PRNGKey(0)
    keys = jax.random.split(key, 16)

    params = {
        # conv weights stored as (K, C_in, C_out)
        "w1": 0.1 * jax.random.normal(keys[0], (kernel_size, input_channels, 32),
                                      jnp.float32),
        "w2": 0.1 * jax.random.normal(keys[1], (8, 32, 64), jnp.float32),
        "w3": 0.1 * jax.random.normal(keys[2], (8, 64, final_out_channels),
                                      jnp.float32),
        # linear weight in torch flatten order: row index = c*features_len + l
        "wl": 0.1 * jax.random.normal(
            keys[3], (features_len * final_out_channels, num_classes),
            jnp.float32),
        "bl": 0.1 * jax.random.normal(keys[4], (1, num_classes), jnp.float32),
    }
    params["s1"], params["sh1"] = make_bn_scale_shift(keys[5], 32)
    params["s2"], params["sh2"] = make_bn_scale_shift(keys[6], 64)
    params["s3"], params["sh3"] = make_bn_scale_shift(keys[7], final_out_channels)

    x_in = jax.random.normal(keys[8], (batch, input_channels, seq_len),
                             jnp.float32)

    logits, feats = base_model_forward(x_in, params, kernel_size, stride)
    logits = jax.block_until_ready(logits)
    feats = jax.block_until_ready(feats)

    assert logits.shape == (batch, num_classes)
    assert feats.shape == (batch, final_out_channels, features_len)

    ref_logits, ref_feats = _ref_forward(x_in, params, kernel_size)
    # bf16 MXU operands (f32 accumulate) -> loose tolerance vs the f32 reference.
    assert jnp.allclose(logits, ref_logits, atol=5e-2, rtol=5e-2)
    assert jnp.allclose(feats, ref_feats, atol=5e-2, rtol=5e-2)

    print("KERNEL_OK")
</pallas_src>

<mosaic_0001>
module attributes {stable_mosaic.version = 11 : i64} {
  func.func @_fused_forward_kernel(%arg0: i32, %arg1: memref<2x16x4xf32, #tpu.memory_space<vmem>>, %arg2: memref<32x32xbf16, #tpu.memory_space<vmem>>, %arg3: memref<1x32xf32, #tpu.memory_space<vmem>>, %arg4: memref<1x32xf32, #tpu.memory_space<vmem>>, %arg5: memref<256x64xbf16, #tpu.memory_space<vmem>>, %arg6: memref<1x64xf32, #tpu.memory_space<vmem>>, %arg7: memref<1x64xf32, #tpu.memory_space<vmem>>, %arg8: memref<512x16xbf16, #tpu.memory_space<vmem>>, %arg9: memref<1x16xf32, #tpu.memory_space<vmem>>, %arg10: memref<1x16xf32, #tpu.memory_space<vmem>>, %arg11: memref<64x5xbf16, #tpu.memory_space<vmem>>, %arg12: memref<1x5xf32, #tpu.memory_space<vmem>>, %arg13: memref<2x5xf32, #tpu.memory_space<vmem>>, %arg14: memref<2x4x16xf32, #tpu.memory_space<vmem>>) attributes {dimension_semantics = [#tpu.dimension_semantics<parallel>], iteration_bounds = array<i64: 1>, scalar_prefetch = 0 : i64, scratch_operands = 0 : i64, tpu.core_type = #tpu.core_type<tc>, window_params = [{transform_indices = @transform_0, window_bounds = array<i64: 2, 16, 4>}, {pipeline_mode = #tpu.pipeline_mode<synchronous>, transform_indices = @transform_1, window_bounds = array<i64: 32, 32>}, {pipeline_mode = #tpu.pipeline_mode<synchronous>, transform_indices = @transform_2, window_bounds = array<i64: 1, 32>}, {pipeline_mode = #tpu.pipeline_mode<synchronous>, transform_indices = @transform_3, window_bounds = array<i64: 1, 32>}, {pipeline_mode = #tpu.pipeline_mode<synchronous>, transform_indices = @transform_4, window_bounds = array<i64: 256, 64>}, {pipeline_mode = #tpu.pipeline_mode<synchronous>, transform_indices = @transform_5, window_bounds = array<i64: 1, 64>}, {pipeline_mode = #tpu.pipeline_mode<synchronous>, transform_indices = @transform_6, window_bounds = array<i64: 1, 64>}, {pipeline_mode = #tpu.pipeline_mode<synchronous>, transform_indices = @transform_7, window_bounds = array<i64: 512, 16>}, {pipeline_mode = #tpu.pipeline_mode<synchronous>, transform_indices = @transform_8, window_bounds = array<i64: 1, 16>}, {pipeline_mode = #tpu.pipeline_mode<synchronous>, transform_indices = @transform_9, window_bounds = array<i64: 1, 16>}, {pipeline_mode = #tpu.pipeline_mode<synchronous>, transform_indices = @transform_10, window_bounds = array<i64: 64, 5>}, {pipeline_mode = #tpu.pipeline_mode<synchronous>, transform_indices = @transform_11, window_bounds = array<i64: 1, 5>}, {transform_indices = @transform_12, window_bounds = array<i64: 2, 5>}, {transform_indices = @transform_13, window_bounds = array<i64: 2, 4, 16>}]} {
    %c0 = arith.constant 0 : index
    %c0_0 = arith.constant 0 : index
    %c0_1 = arith.constant 0 : index
    %0 = vector.load %arg1[%c0, %c0_0, %c0_1] : memref<2x16x4xf32, #tpu.memory_space<vmem>>, vector<2x16x4xf32>
    %c0_2 = arith.constant 0 : index
    %c0_3 = arith.constant 0 : index
    %1 = vector.load %arg2[%c0_2, %c0_3] : memref<32x32xbf16, #tpu.memory_space<vmem>>, vector<32x32xbf16>
    %c0_4 = arith.constant 0 : index
    %c0_5 = arith.constant 0 : index
    %2 = vector.load %arg3[%c0_4, %c0_5] : memref<1x32xf32, #tpu.memory_space<vmem>>, vector<1x32xf32>
    %c0_6 = arith.constant 0 : index
    %c0_7 = arith.constant 0 : index
    %3 = vector.load %arg4[%c0_6, %c0_7] : memref<1x32xf32, #tpu.memory_space<vmem>>, vector<1x32xf32>
    %cst = arith.constant 0.000000e+00 : f32
    %4 = vector.broadcast %cst : f32 to vector<2x4x4xf32>
    %5 = tpu.concatenate %4, %0, %4 in 1 : vector<2x4x4xf32>, vector<2x16x4xf32>, vector<2x4x4xf32> -> vector<2x24x4xf32>
    %6 = vector.extract_strided_slice %5 {offsets = [0, 0, 0], sizes = [2, 17, 4], strides = [1, 1, 1]} : vector<2x24x4xf32> to vector<2x17x4xf32>
    %7 = vector.extract_strided_slice %5 {offsets = [0, 1, 0], sizes = [2, 17, 4], strides = [1, 1, 1]} : vector<2x24x4xf32> to vector<2x17x4xf32>
    %8 = vector.extract_strided_slice %5 {offsets = [0, 2, 0], sizes = [2, 17, 4], strides = [1, 1, 1]} : vector<2x24x4xf32> to vector<2x17x4xf32>
    %9 = vector.extract_strided_slice %5 {offsets = [0, 3, 0], sizes = [2, 17, 4], strides = [1, 1, 1]} : vector<2x24x4xf32> to vector<2x17x4xf32>
    %10 = vector.extract_strided_slice %5 {offsets = [0, 4, 0], sizes = [2, 17, 4], strides = [1, 1, 1]} : vector<2x24x4xf32> to vector<2x17x4xf32>
    %11 = vector.extract_strided_slice %5 {offsets = [0, 5, 0], sizes = [2, 17, 4], strides = [1, 1, 1]} : vector<2x24x4xf32> to vector<2x17x4xf32>
    %12 = vector.extract_strided_slice %5 {offsets = [0, 6, 0], sizes = [2, 17, 4], strides = [1, 1, 1]} : vector<2x24x4xf32> to vector<2x17x4xf32>
    %13 = vector.extract_strided_slice %5 {offsets = [0, 7, 0], sizes = [2, 17, 4], strides = [1, 1, 1]} : vector<2x24x4xf32> to vector<2x17x4xf32>
    %14 = tpu.concatenate %6, %7, %8, %9, %10, %11, %12, %13 in 2 : vector<2x17x4xf32>, vector<2x17x4xf32>, vector<2x17x4xf32>, vector<2x17x4xf32>, vector<2x17x4xf32>, vector<2x17x4xf32>, vector<2x17x4xf32>, vector<2x17x4xf32> -> vector<2x17x32xf32>
    %15 = vector.shape_cast %14 : vector<2x17x32xf32> to vector<34x32xf32>
    %16 = arith.truncf %15 : vector<34x32xf32> to vector<34x32xbf16>
    %cst_8 = arith.constant dense<0.000000e+00> : vector<34x32xf32>
    %17 = tpu.matmul %16, %1, %cst_8 {dimension_numbers = #tpu.dot_dimension_numbers<[1], [0], [0], [1], [0, 0, 1, 1], [], []>} : vector<34x32xbf16>, vector<32x32xbf16>, vector<34x32xf32> -> vector<34x32xf32>
    %18 = vector.broadcast %2 : vector<1x32xf32> to vector<34x32xf32>
    %19 = arith.mulf %17, %18 : vector<34x32xf32>
    %20 = vector.broadcast %3 : vector<1x32xf32> to vector<34x32xf32>
    %21 = arith.addf %19, %20 : vector<34x32xf32>
    %cst_9 = arith.constant 0.000000e+00 : f32
    %22 = vector.broadcast %cst_9 : f32 to vector<34x32xf32>
    %23 = arith.maximumf %21, %22 : vector<34x32xf32>
    %24 = vector.shape_cast %23 : vector<34x32xf32> to vector<2x17x32xf32>
    %25 = vector.extract_strided_slice %24 {offsets = [0, 0, 0], sizes = [2, 1, 32], strides = [1, 1, 1]} : vector<2x17x32xf32> to vector<2x1x32xf32>
    %26 = vector.extract_strided_slice %24 {offsets = [0, 1, 0], sizes = [2, 16, 32], strides = [1, 1, 1]} : vector<2x17x32xf32> to vector<2x16x32xf32>
    %27 = vector.shape_cast %26 : vector<2x16x32xf32> to vector<2x8x2x32xf32>
    %cst_10 = arith.constant dense<0xFF800000> : vector<2x8x32xf32>
    %28 = vector.multi_reduction <maximumf>, %27, %cst_10 [2] : vector<2x8x2x32xf32> to vector<2x8x32xf32>
    %29 = tpu.concatenate %25, %28 in 1 : vector<2x1x32xf32>, vector<2x8x32xf32> -> vector<2x9x32xf32>
    %c0_11 = arith.constant 0 : index
    %c0_12 = arith.constant 0 : index
    %30 = vector.load %arg5[%c0_11, %c0_12] : memref<256x64xbf16, #tpu.memory_space<vmem>>, vector<256x64xbf16>
    %c0_13 = arith.constant 0 : index
    %c0_14 = arith.constant 0 : index
    %31 = vector.load %arg6[%c0_13, %c0_14] : memref<1x64xf32, #tpu.memory_space<vmem>>, vector<1x64xf32>
    %c0_15 = arith.constant 0 : index
    %c0_16 = arith.constant 0 : index
    %32 = vector.load %arg7[%c0_15, %c0_16] : memref<1x64xf32, #tpu.memory_space<vmem>>, vector<1x64xf32>
    %cst_17 = arith.constant 0.000000e+00 : f32
    %33 = vector.broadcast %cst_17 : f32 to vector<2x4x32xf32>
    %34 = tpu.concatenate %33, %29, %33 in 1 : vector<2x4x32xf32>, vector<2x9x32xf32>, vector<2x4x32xf32> -> vector<2x17x32xf32>
    %35 = vector.extract_strided_slice %34 {offsets = [0, 0, 0], sizes = [2, 10, 32], strides = [1, 1, 1]} : vector<2x17x32xf32> to vector<2x10x32xf32>
    %36 = vector.extract_strided_slice %34 {offsets = [0, 1, 0], sizes = [2, 10, 32], strides = [1, 1, 1]} : vector<2x17x32xf32> to vector<2x10x32xf32>
    %37 = vector.extract_strided_slice %34 {offsets = [0, 2, 0], sizes = [2, 10, 32], strides = [1, 1, 1]} : vector<2x17x32xf32> to vector<2x10x32xf32>
    %38 = vector.extract_strided_slice %34 {offsets = [0, 3, 0], sizes = [2, 10, 32], strides = [1, 1, 1]} : vector<2x17x32xf32> to vector<2x10x32xf32>
    %39 = vector.extract_strided_slice %34 {offsets = [0, 4, 0], sizes = [2, 10, 32], strides = [1, 1, 1]} : vector<2x17x32xf32> to vector<2x10x32xf32>
    %40 = vector.extract_strided_slice %34 {offsets = [0, 5, 0], sizes = [2, 10, 32], strides = [1, 1, 1]} : vector<2x17x32xf32> to vector<2x10x32xf32>
    %41 = vector.extract_strided_slice %34 {offsets = [0, 6, 0], sizes = [2, 10, 32], strides = [1, 1, 1]} : vector<2x17x32xf32> to vector<2x10x32xf32>
    %42 = vector.extract_strided_slice %34 {offsets = [0, 7, 0], sizes = [2, 10, 32], strides = [1, 1, 1]} : vector<2x17x32xf32> to vector<2x10x32xf32>
    %43 = tpu.concatenate %35, %36, %37, %38, %39, %40, %41, %42 in 2 : vector<2x10x32xf32>, vector<2x10x32xf32>, vector<2x10x32xf32>, vector<2x10x32xf32>, vector<2x10x32xf32>, vector<2x10x32xf32>, vector<2x10x32xf32>, vector<2x10x32xf32> -> vector<2x10x256xf32>
    %44 = vector.shape_cast %43 : vector<2x10x256xf32> to vector<20x256xf32>
    %45 = arith.truncf %44 : vector<20x256xf32> to vector<20x256xbf16>
    %cst_18 = arith.constant dense<0.000000e+00> : vector<20x64xf32>
    %46 = tpu.matmul %45, %30, %cst_18 {dimension_numbers = #tpu.dot_dimension_numbers<[1], [0], [0], [1], [0, 0, 1, 1], [], []>} : vector<20x256xbf16>, vector<256x64xbf16>, vector<20x64xf32> -> vector<20x64xf32>
    %47 = vector.broadcast %31 : vector<1x64xf32> to vector<20x64xf32>
    %48 = arith.mulf %46, %47 : vector<20x64xf32>
    %49 = vector.broadcast %32 : vector<1x64xf32> to vector<20x64xf32>
    %50 = arith.addf %48, %49 : vector<20x64xf32>
    %cst_19 = arith.constant 0.000000e+00 : f32
    %51 = vector.broadcast %cst_19 : f32 to vector<20x64xf32>
    %52 = arith.maximumf %50, %51 : vector<20x64xf32>
    %53 = vector.shape_cast %52 : vector<20x64xf32> to vector<2x10x64xf32>
    %54 = vector.extract_strided_slice %53 {offsets = [0, 0, 0], sizes = [2, 1, 64], strides = [1, 1, 1]} : vector<2x10x64xf32> to vector<2x1x64xf32>
    %55 = vector.extract_strided_slice %53 {offsets = [0, 1, 0], sizes = [2, 8, 64], strides = [1, 1, 1]} : vector<2x10x64xf32> to vector<2x8x64xf32>
    %56 = vector.shape_cast %55 : vector<2x8x64xf32> to vector<2x4x2x64xf32>
    %cst_20 = arith.constant dense<0xFF800000> : vector<2x4x64xf32>
    %57 = vector.multi_reduction <maximumf>, %56, %cst_20 [2] : vector<2x4x2x64xf32> to vector<2x4x64xf32>
    %58 = vector.extract_strided_slice %53 {offsets = [0, 9, 0], sizes = [2, 1, 64], strides = [1, 1, 1]} : vector<2x10x64xf32> to vector<2x1x64xf32>
    %59 = tpu.concatenate %54, %57, %58 in 1 : vector<2x1x64xf32>, vector<2x4x64xf32>, vector<2x1x64xf32> -> vector<2x6x64xf32>
    %c0_21 = arith.constant 0 : index
    %c0_22 = arith.constant 0 : index
    %60 = vector.load %arg8[%c0_21, %c0_22] : memref<512x16xbf16, #tpu.memory_space<vmem>>, vector<512x16xbf16>
    %c0_23 = arith.constant 0 : index
    %c0_24 = arith.constant 0 : index
    %61 = vector.load %arg9[%c0_23, %c0_24] : memref<1x16xf32, #tpu.memory_space<vmem>>, vector<1x16xf32>
    %c0_25 = arith.constant 0 : index
    %c0_26 = arith.constant 0 : index
    %62 = vector.load %arg10[%c0_25, %c0_26] : memref<1x16xf32, #tpu.memory_space<vmem>>, vector<1x16xf32>
    %cst_27 = arith.constant 0.000000e+00 : f32
    %63 = vector.broadcast %cst_27 : f32 to vector<2x4x64xf32>
    %64 = tpu.concatenate %63, %59, %63 in 1 : vector<2x4x64xf32>, vector<2x6x64xf32>, vector<2x4x64xf32> -> vector<2x14x64xf32>
    %65 = vector.extract_strided_slice %64 {offsets = [0, 0, 0], sizes = [2, 7, 64], strides = [1, 1, 1]} : vector<2x14x64xf32> to vector<2x7x64xf32>
    %66 = vector.extract_strided_slice %64 {offsets = [0, 1, 0], sizes = [2, 7, 64], strides = [1, 1, 1]} : vector<2x14x64xf32> to vector<2x7x64xf32>
    %67 = vector.extract_strided_slice %64 {offsets = [0, 2, 0], sizes = [2, 7, 64], strides = [1, 1, 1]} : vector<2x14x64xf32> to vector<2x7x64xf32>
    %68 = vector.extract_strided_slice %64 {offsets = [0, 3, 0], sizes = [2, 7, 64], strides = [1, 1, 1]} : vector<2x14x64xf32> to vector<2x7x64xf32>
    %69 = vector.extract_strided_slice %64 {offsets = [0, 4, 0], sizes = [2, 7, 64], strides = [1, 1, 1]} : vector<2x14x64xf32> to vector<2x7x64xf32>
    %70 = vector.extract_strided_slice %64 {offsets = [0, 5, 0], sizes = [2, 7, 64], strides = [1, 1, 1]} : vector<2x14x64xf32> to vector<2x7x64xf32>
    %71 = vector.extract_strided_slice %64 {offsets = [0, 6, 0], sizes = [2, 7, 64], strides = [1, 1, 1]} : vector<2x14x64xf32> to vector<2x7x64xf32>
    %72 = vector.extract_strided_slice %64 {offsets = [0, 7, 0], sizes = [2, 7, 64], strides = [1, 1, 1]} : vector<2x14x64xf32> to vector<2x7x64xf32>
    %73 = tpu.concatenate %65, %66, %67, %68, %69, %70, %71, %72 in 2 : vector<2x7x64xf32>, vector<2x7x64xf32>, vector<2x7x64xf32>, vector<2x7x64xf32>, vector<2x7x64xf32>, vector<2x7x64xf32>, vector<2x7x64xf32>, vector<2x7x64xf32> -> vector<2x7x512xf32>
    %74 = vector.shape_cast %73 : vector<2x7x512xf32> to vector<14x512xf32>
    %75 = arith.truncf %74 : vector<14x512xf32> to vector<14x512xbf16>
    %cst_28 = arith.constant dense<0.000000e+00> : vector<14x16xf32>
    %76 = tpu.matmul %75, %60, %cst_28 {dimension_numbers = #tpu.dot_dimension_numbers<[1], [0], [0], [1], [0, 0, 1, 1], [], []>} : vector<14x512xbf16>, vector<512x16xbf16>, vector<14x16xf32> -> vector<14x16xf32>
    %77 = vector.broadcast %61 : vector<1x16xf32> to vector<14x16xf32>
    %78 = arith.mulf %76, %77 : vector<14x16xf32>
    %79 = vector.broadcast %62 : vector<1x16xf32> to vector<14x16xf32>
    %80 = arith.addf %78, %79 : vector<14x16xf32>
    %cst_29 = arith.constant 0.000000e+00 : f32
    %81 = vector.broadcast %cst_29 : f32 to vector<14x16xf32>
    %82 = arith.maximumf %80, %81 : vector<14x16xf32>
    %83 = vector.shape_cast %82 : vector<14x16xf32> to vector<2x7x16xf32>
    %84 = vector.extract_strided_slice %83 {offsets = [0, 0, 0], sizes = [2, 1, 16], strides = [1, 1, 1]} : vector<2x7x16xf32> to vector<2x1x16xf32>
    %85 = vector.extract_strided_slice %83 {offsets = [0, 1, 0], sizes = [2, 6, 16], strides = [1, 1, 1]} : vector<2x7x16xf32> to vector<2x6x16xf32>
    %86 = vector.shape_cast %85 : vector<2x6x16xf32> to vector<2x3x2x16xf32>
    %cst_30 = arith.constant dense<0xFF800000> : vector<2x3x16xf32>
    %87 = vector.multi_reduction <maximumf>, %86, %cst_30 [2] : vector<2x3x2x16xf32> to vector<2x3x16xf32>
    %88 = tpu.concatenate %84, %87 in 1 : vector<2x1x16xf32>, vector<2x3x16xf32> -> vector<2x4x16xf32>
    %c0_31 = arith.constant 0 : index
    %c0_32 = arith.constant 0 : index
    %c0_33 = arith.constant 0 : index
    %89 = vector.load %arg14[%c0_31, %c0_32, %c0_33] : memref<2x4x16xf32, #tpu.memory_space<vmem>>, vector<2x4x16xf32>
    tpu.vector_store %arg14[%c0_31, %c0_32, %c0_33], %88 {strides = array<i32>} : memref<2x4x16xf32, #tpu.memory_space<vmem>>, vector<2x4x16xf32>,
    %90 = vector.extract_strided_slice %88 {offsets = [0, 0, 0], sizes = [2, 1, 16], strides = [1, 1, 1]} : vector<2x4x16xf32> to vector<2x1x16xf32>
    %91 = vector.shape_cast %90 : vector<2x1x16xf32> to vector<2x16xf32>
    %92 = vector.extract_strided_slice %88 {offsets = [0, 1, 0], sizes = [2, 1, 16], strides = [1, 1, 1]} : vector<2x4x16xf32> to vector<2x1x16xf32>
    %93 = vector.shape_cast %92 : vector<2x1x16xf32> to vector<2x16xf32>
    %94 = vector.extract_strided_slice %88 {offsets = [0, 2, 0], sizes = [2, 1, 16], strides = [1, 1, 1]} : vector<2x4x16xf32> to vector<2x1x16xf32>
    %95 = vector.shape_cast %94 : vector<2x1x16xf32> to vector<2x16xf32>
    %96 = vector.extract_strided_slice %88 {offsets = [0, 3, 0], sizes = [2, 1, 16], strides = [1, 1, 1]} : vector<2x4x16xf32> to vector<2x1x16xf32>
    %97 = vector.shape_cast %96 : vector<2x1x16xf32> to vector<2x16xf32>
    %98 = tpu.concatenate %91, %93, %95, %97 in 1 : vector<2x16xf32>, vector<2x16xf32>, vector<2x16xf32>, vector<2x16xf32> -> vector<2x64xf32>
    %99 = arith.truncf %98 : vector<2x64xf32> to vector<2x64xbf16>
    %c0_34 = arith.constant 0 : index
    %c0_35 = arith.constant 0 : index
    %100 = vector.load %arg11[%c0_34, %c0_35] : memref<64x5xbf16, #tpu.memory_space<vmem>>, vector<64x5xbf16>
    %cst_36 = arith.constant dense<0.000000e+00> : vector<2x5xf32>
    %101 = tpu.matmul %99, %100, %cst_36 {dimension_numbers = #tpu.dot_dimension_numbers<[1], [0], [0], [1], [0, 0, 1, 1], [], []>} : vector<2x64xbf16>, vector<64x5xbf16>, vector<2x5xf32> -> vector<2x5xf32>
    %c0_37 = arith.constant 0 : index
    %c0_38 = arith.constant 0 : index
    %102 = vector.load %arg12[%c0_37, %c0_38] : memref<1x5xf32, #tpu.memory_space<vmem>>, vector<1x5xf32>
    %103 = vector.broadcast %102 : vector<1x5xf32> to vector<2x5xf32>
    %104 = arith.addf %101, %103 : vector<2x5xf32>
    %c0_39 = arith.constant 0 : index
    %c0_40 = arith.constant 0 : index
    %105 = vector.load %arg13[%c0_39, %c0_40] : memref<2x5xf32, #tpu.memory_space<vmem>>, vector<2x5xf32>
    tpu.vector_store %arg13[%c0_39, %c0_40], %104 {strides = array<i32>} : memref<2x5xf32, #tpu.memory_space<vmem>>, vector<2x5xf32>,
    return
  }
  func.func @transform_0(%arg0: i32) -> (i32, i32, i32) {
    %c0_i32 = arith.constant 0 : i32
    %c0_i32_0 = arith.constant 0 : i32
    %c0_i32_1 = arith.constant 0 : i32
    return %arg0, %c0_i32, %c0_i32_0 : i32, i32, i32
  }
  func.func @transform_1(%arg0: i32) -> (i32, i32) {
    %c0_i32 = arith.constant 0 : i32
    %c0_i32_0 = arith.constant 0 : i32
    %c0_i32_1 = arith.constant 0 : i32
    return %c0_i32, %c0_i32_0 : i32, i32
  }
  func.func @transform_2(%arg0: i32) -> (i32, i32) {
    %c0_i32 = arith.constant 0 : i32
    %c0_i32_0 = arith.constant 0 : i32
    %c0_i32_1 = arith.constant 0 : i32
    return %c0_i32, %c0_i32_0 : i32, i32
  }
  func.func @transform_3(%arg0: i32) -> (i32, i32) {
    %c0_i32 = arith.constant 0 : i32
    %c0_i32_0 = arith.constant 0 : i32
    %c0_i32_1 = arith.constant 0 : i32
    return %c0_i32, %c0_i32_0 : i32, i32
  }
  func.func @transform_4(%arg0: i32) -> (i32, i32) {
    %c0_i32 = arith.constant 0 : i32
    %c0_i32_0 = arith.constant 0 : i32
    %c0_i32_1 = arith.constant 0 : i32
    return %c0_i32, %c0_i32_0 : i32, i32
  }
  func.func @transform_5(%arg0: i32) -> (i32, i32) {
    %c0_i32 = arith.constant 0 : i32
    %c0_i32_0 = arith.constant 0 : i32
    %c0_i32_1 = arith.constant 0 : i32
    return %c0_i32, %c0_i32_0 : i32, i32
  }
  func.func @transform_6(%arg0: i32) -> (i32, i32) {
    %c0_i32 = arith.constant 0 : i32
    %c0_i32_0 = arith.constant 0 : i32
    %c0_i32_1 = arith.constant 0 : i32
    return %c0_i32, %c0_i32_0 : i32, i32
  }
  func.func @transform_7(%arg0: i32) -> (i32, i32) {
    %c0_i32 = arith.constant 0 : i32
    %c0_i32_0 = arith.constant 0 : i32
    %c0_i32_1 = arith.constant 0 : i32
    return %c0_i32, %c0_i32_0 : i32, i32
  }
  func.func @transform_8(%arg0: i32) -> (i32, i32) {
    %c0_i32 = arith.constant 0 : i32
    %c0_i32_0 = arith.constant 0 : i32
    %c0_i32_1 = arith.constant 0 : i32
    return %c0_i32, %c0_i32_0 : i32, i32
  }
  func.func @transform_9(%arg0: i32) -> (i32, i32) {
    %c0_i32 = arith.constant 0 : i32
    %c0_i32_0 = arith.constant 0 : i32
    %c0_i32_1 = arith.constant 0 : i32
    return %c0_i32, %c0_i32_0 : i32, i32
  }
  func.func @transform_10(%arg0: i32) -> (i32, i32) {
    %c0_i32 = arith.constant 0 : i32
    %c0_i32_0 = arith.constant 0 : i32
    %c0_i32_1 = arith.constant 0 : i32
    return %c0_i32, %c0_i32_0 : i32, i32
  }
  func.func @transform_11(%arg0: i32) -> (i32, i32) {
    %c0_i32 = arith.constant 0 : i32
    %c0_i32_0 = arith.constant 0 : i32
    %c0_i32_1 = arith.constant 0 : i32
    return %c0_i32, %c0_i32_0 : i32, i32
  }
  func.func @transform_12(%arg0: i32) -> (i32, i32) {
    %c0_i32 = arith.constant 0 : i32
    %c0_i32_0 = arith.constant 0 : i32
    return %arg0, %c0_i32 : i32, i32
  }
  func.func @transform_13(%arg0: i32) -> (i32, i32, i32) {
    %c0_i32 = arith.constant 0 : i32
    %c0_i32_0 = arith.constant 0 : i32
    %c0_i32_1 = arith.constant 0 : i32
    return %arg0, %c0_i32, %c0_i32_0 : i32, i32, i32
  }
}

</mosaic_0001>

<bundles_post_ra>
// kernel: tpu_custom_call.1
= control target key start
LH: loop header
LB: loop body
LE: loop exit
PB: predicated region body
PF: predicated region fallthrough
CT: control target
= control target key end

     0   :  { %19 = vsyncpa [#allocation3], 0  ;;  %vm60_vm0 = vcmask 1043456   ;;  %vm110_vm1 = vcmask 1045504   ;;  %vm81_vm2 = vcmask 1046528   ;;  %s3604_s29 = smov 8   ;;  %s4669_s0 = inlined_call_operand.vmem [shape: f32[2,16,4], index: 0, kind: input, shape index: {}]   ;;  %s4670_s1 = inlined_call_operand.vmem [shape: bf16[32,32], index: 1, kind: input, shape index: {}]   ;;  %s4671_s2 = inlined_call_operand.vmem [shape: f32[1,32], index: 2, kind: input, shape index: {}]   ;;  %s4672_s3 = inlined_call_operand.vmem [shape: f32[1,32], index: 3, kind: input, shape index: {}]   ;;  %s4673_s4 = inlined_call_operand.vmem [shape: bf16[256,64], index: 4, kind: input, shape index: {}]   ;;  %s4674_s5 = inlined_call_operand.vmem [shape: f32[1,64], index: 5, kind: input, shape index: {}]   ;;  %s4675_s6 = inlined_call_operand.vmem [shape: f32[1,64], index: 6, kind: input, shape index: {}]   ;;  %s4676_s7 = inlined_call_operand.vmem [shape: bf16[512,16], index: 7, kind: input, shape index: {}]   ;;  %s4677_s8 = inlined_call_operand.vmem [shape: f32[1,16], index: 8, kind: input, shape index: {}]   ;;  %s4678_s9 = inlined_call_operand.vmem [shape: f32[1,16], index: 9, kind: input, shape index: {}]   ;;  %s4679_s10 = inlined_call_operand.vmem [shape: bf16[64,5], index: 10, kind: input, shape index: {}]   ;;  %s4680_s11 = inlined_call_operand.vmem [shape: f32[1,5], index: 11, kind: input, shape index: {}]   ;;  %s4681_s12 = inlined_call_operand.hbm [shape: f32[2,5], index: 12, kind: output, shape index: {0}]   ;;  %s4682_s13 = inlined_call_operand.hbm [shape: f32[2,4,16], index: 13, kind: output, shape index: {1}]  }
   0x1   :  { %v46_v0 = vld [vmem:[%s4669_s0] sm:$0xff]  ;;  %v47_v1 = vld [vmem:[%s4669_s0 + $0x8] sm:$0xff]  ;;  %s3605_s30 = smov 4   ;;  %vm139_vm3 = vcmask 1044480   ;;  %v48_v25 = vld [vmem:[%s4669_s0 + $0x10] sm:$0xff]  ;;  %s3606_s18 = smov 12  }
   0x2   :  { %v61_v2 = vrot.slane %v46_v0, 4  ;;  %v62_v3 = vrot.slane %v47_v1, 4  ;;  %v49_v26 = vld [vmem:[%s4669_s0 + $0x18] sm:$0xff]  ;;  %vm196_vm4 = vcmask 1042432   ;;  %v64_v32 = vrot.slane %v48_v25, 4  ;;  %s3607_s0 = smov 16  }
   0x3   :  { %v65_v33 = vrot.slane %v49_v26, 4  ;;  %vm225_vm5 = vcmask 1041408   ;;  %vm254_vm6 = vcmask 1040384   ;;  %s3608_s19 = smov 20   ;;  %s3609_s20 = smov 24   ;;  %v3502_v61 = vld [vmem:[%s4670_s1] sm:$0xff]  }
   0x4   :  { %v3698_v4 = vsel %vm60_vm0, %v61_v2, %v62_v3  ;;  %v3701_v5 = vsel %vm60_vm0, 0.0, %v61_v2  ;;  %v3704_v6 = vsel %vm60_vm0, %v62_v3, 0.0  ;;  %v3762_v40 = vsel %vm60_vm0, 0.0, %v64_v32  ;;  %s3610_s21 = smov 28   ;;  %v3503_v2 = vld [vmem:[%s4670_s1 + $0x8] sm:$0xff]  }
   0x5   :  { %v111_v7 = vrot.slane %v3701_v5, 2  ;;  %v112_v8 = vrot.slane %v3698_v4, 2  ;;  %v82_v9 = vrot.slane %v3701_v5, 1  ;;  %v83_v10 = vrot.slane %v3698_v4, 1 }
   0x6   :  { %v114_v11 = vrot.slane %v3704_v6, 2  ;;  %v85_v12 = vrot.slane %v3704_v6, 1  ;;  %v141_v15 = vrot.slane %v3698_v4, 3  ;;  %v143_v18 = vrot.slane %v3704_v6, 3 }
   0x7   :  { %v113_v13 = vsel %vm110_vm1, %v111_v7, %v112_v8  ;;  %v84_v14 = vsel %vm81_vm2, %v82_v9, %v83_v10  ;;  %v140_v19 = vrot.slane %v3701_v5, 3  ;;  %v169_v20 = vrot.slane %v3698_v4, 4 }
   0x8   :  { %121 = vrot.lane.b32.xlu1 %v113_v13, %s3604_s29  ;;  %92 = vrot.lane.b32.xlu0 %v84_v14, %s3605_s30  ;;  %v115_v16 = vsel %vm110_vm1, %v112_v8, %v114_v11  ;;  %v86_v17 = vsel %vm81_vm2, %v83_v10, %v85_v12  ;;  %v144_v21 = vsel %vm139_vm3, %v141_v15, %v143_v18  ;;  %v171_v23 = vrot.slane %v3704_v6, 4 }
   0x9   :  { %v142_v22 = vsel %vm139_vm3, %v140_v19, %v141_v15  ;;  %v168_v24 = vrot.slane %v3701_v5, 4  ;;  %v198_v27 = vrot.slane %v3698_v4, 5  ;;  %v200_v30 = vrot.slane %v3704_v6, 5 }
   0xa   :  { %v172_v28 = vsel %vm60_vm0, %v169_v20, %v171_v23  ;;  %v197_v31 = vrot.slane %v3701_v5, 5  ;;  %v227_v34 = vrot.slane %v3698_v4, 6  ;;  %v229_v35 = vrot.slane %v3704_v6, 6 }
   0xb   :  { %v170_v29 = vsel %vm60_vm0, %v168_v24, %v169_v20  ;;  %v226_v36 = vrot.slane %v3701_v5, 6  ;;  %v201_v37 = vsel %vm196_vm4, %v198_v27, %v200_v30  ;;  %v3759_v39 = vsel %vm60_vm0, %v64_v32, %v65_v33 }
   0xc   :  { %123 = vrot.lane.b32.xlu1 %v115_v16, %s3604_s29  ;;  %94 = vrot.lane.b32.xlu0 %v86_v17, %s3605_s30  ;;  %v199_v38 = vsel %vm196_vm4, %v197_v31, %v198_v27  ;;  %v230_v41 = vsel %vm225_vm5, %v227_v34, %v229_v35  ;;  %v255_v43 = vrot.slane %v3701_v5, 7  ;;  %v256_v44 = vrot.slane %v3698_v4, 7 }
   0xd   :  { %v228_v42 = vsel %vm225_vm5, %v226_v36, %v227_v34  ;;  %v87_v45 = vrot.slane %v3762_v40, 1  ;;  %v88_v46 = vrot.slane %v3759_v39, 1  ;;  %v116_v47 = vrot.slane %v3762_v40, 2 }
   0xe   :  { %v258_v48 = vrot.slane %v3704_v6, 7  ;;  %v117_v49 = vrot.slane %v3759_v39, 2  ;;  %v145_v50 = vrot.slane %v3762_v40, 3  ;;  %v146_v51 = vrot.slane %v3759_v39, 3 }
   0xf   :  { %v3782_v52 = vsel %vm60_vm0, %v65_v33, 0.0  ;;  %v257_v53 = vsel %vm254_vm6, %v255_v43, %v256_v44  ;;  %v89_v54 = vsel %vm81_vm2, %v87_v45, %v88_v46  ;;  %v173_v56 = vrot.slane %v3762_v40, 4 }
  0x10   :  { %152 = vrot.lane.b32.xlu1 %v144_v21, %s3606_s18  ;;  %150 = vrot.lane.b32.xlu0 %v142_v22, %s3606_s18  ;;  %v90_v55 = vrot.slane %v3782_v52, 1  ;;  %v118_v57 = vsel %vm110_vm1, %v116_v47, %v117_v49  ;;  %v259_v58 = vsel %vm254_vm6, %v256_v44, %v258_v48  ;;  %v174_v59 = vrot.slane %v3759_v39, 4 }
  0x11   :  { %v119_v60 = vrot.slane %v3782_v52, 2  ;;  %v147_v62 = vsel %vm139_vm3, %v145_v50, %v146_v51  ;;  %v3611_v0 = vmov 0.0   ;;  %v202_v1 = vrot.slane %v3762_v40, 5 }
  0x12   :  { %v91_v63 = vsel %vm81_vm2, %v88_v46, %v90_v55  ;;  %3457 = vmatprep.subr.bf16.mxu0 %v3611_v0  ;;  %v203_v3 = vrot.slane %v3759_v39, 5  ;;  %v148_v7 = vrot.slane %v3782_v52, 3  ;;  %v175_v8 = vsel %vm60_vm0, %v173_v56, %v174_v59 }
  0x13   :  { %3458 = vmatpush3.bf16.msra.mxu0 %v3502_v61  ;;  %v120_v9 = vsel %vm110_vm1, %v117_v49, %v119_v60  ;;  %v231_v10 = vrot.slane %v3762_v40, 6  ;;  %v232_v13 = vrot.slane %v3759_v39, 6  ;;  %v176_v14 = vrot.slane %v3782_v52, 4 }
  0x14   :  { %180 = vrot.lane.b32.xlu1 %v172_v28, %s3607_s0  ;;  %178 = vrot.lane.b32.xlu0 %v170_v29, %s3607_s0  ;;  %v204_v15 = vsel %vm196_vm4, %v202_v1, %v203_v3  ;;  %v149_v16 = vsel %vm139_vm3, %v146_v51, %v148_v7  ;;  %vm3612_vm7 = vmmov 0   ;;  %v205_v17 = vrot.slane %v3782_v52, 5 }
  0x15   :  { %3459 = vmatprep.subr.bf16.mxu0 %v3611_v0  ;;  %3461 = vmatprep.mubr.msk.bf16.mxu0 %vm3612_vm7, %v3611_v0  ;;  %v233_v19 = vsel %vm225_vm5, %v231_v10, %v232_v13  ;;  %v177_v20 = vsel %vm60_vm0, %v174_v59, %v176_v14  ;;  %v260_v21 = vrot.slane %v3762_v40, 7  ;;  %v261_v22 = vrot.slane %v3759_v39, 7 }
  0x16   :  { %v206_v24 = vsel %vm196_vm4, %v203_v3, %v205_v17 }
  0x17   :  { %3460 = vmatpush3.bf16.msra.mxu0 %v3503_v2 }
  0x18   :  { %209 = vrot.lane.b32.xlu1 %v201_v37, %s3608_s19  ;;  %207 = vrot.lane.b32.xlu0 %v199_v38, %s3608_s19 }
  0x1c   :  { %238 = vrot.lane.b32.xlu1 %v230_v41, %s3609_s20  ;;  %236 = vrot.lane.b32.xlu0 %v228_v42, %s3609_s20 }
  0x20   :  { %265 = vrot.lane.b32.xlu1 %v257_v53, %s3610_s21  ;;  %98 = vrot.lane.b32.xlu0 %v89_v54, %s3605_s30 }
  0x24   :  { %127 = vrot.lane.b32.xlu1 %v118_v57, %s3604_s29  ;;  %267 = vrot.lane.b32.xlu0 %v259_v58, %s3610_s21 }
  0x28   :  { %156 = vrot.lane.b32.xlu1 %v147_v62, %s3606_s18  ;;  %100 = vrot.lane.b32.xlu0 %v91_v63, %s3605_s30 }
  0x2c   :  { %184 = vrot.lane.b32.xlu1 %v175_v8, %s3607_s0  ;;  %129 = vrot.lane.b32.xlu0 %v120_v9, %s3604_s29 }
  0x30   :  { %213 = vrot.lane.b32.xlu1 %v204_v15, %s3608_s19  ;;  %158 = vrot.lane.b32.xlu0 %v149_v16, %s3606_s18 }
  0x34   :  { %242 = vrot.lane.b32.xlu1 %v233_v19, %s3609_s20  ;;  %186 = vrot.lane.b32.xlu0 %v177_v20, %s3607_s0 }
  0x35   :  { %20 = vsyncpa [#allocation5], 0  ;;  %v262_v25 = vsel %vm254_vm6, %v260_v21, %v261_v22  ;;  %v234_v26 = vrot.slane %v3782_v52, 6  ;;  %v263_v28 = vrot.slane %v3782_v52, 7  ;;  %vm283_vm8 = vcmask 31744  }
  0x36   :  { %v3613_v34 = vmov 1966171168   ;;  %v342_v36 = vlaneseq  ;;  %vm290_vm9 = vcmask 64512   ;;  %vm297_vm10 = vcmask 97280  }
  0x37   :  { %v235_v27 = vsel %vm225_vm5, %v232_v13, %v234_v26  ;;  %vm4683_vm11 = vcmask 130048   ;;  %vm311_vm12 = vcmask 162816   ;;  %vm318_vm13 = vcmask 195584  }
  0x38   :  { %215 = vrot.lane.b32.xlu1 %v206_v24, %s3608_s19  ;;  %96 = vrot.lane.b32.xlu0 %v85_v12, %s3605_s30  ;;  %v264_v12 = vsel %vm254_vm6, %v261_v22, %v263_v28  ;;  %v3873_v43 = vshrl.u32 %v342_v36, 7  ;;  %vm325_vm14 = vcmask 228352   ;;  %vm793_vm15 = vcmask 261120  }
  0x3c   :  { %125 = vrot.lane.b32.xlu1 %v114_v11, %s3604_s29  ;;  %271 = vrot.lane.b32.xlu0 %v262_v25, %s3610_s21 }
  0x40   :  { %154 = vrot.lane.b32.xlu1 %v143_v18, %s3606_s18  ;;  %244 = vrot.lane.b32.xlu0 %v235_v27, %s3609_s20 }
  0x44   :  { %182 = vrot.lane.b32.xlu1 %v171_v23, %s3607_s0  ;;  %273 = vrot.lane.b32.xlu0 %v264_v12, %s3610_s21 }
  0x48   :  { %211 = vrot.lane.b32.xlu0 %v200_v30, %s3608_s19  ;;  %240 = vrot.lane.b32.xlu1 %v229_v35, %s3609_s20  ;;  %v340_v35 = vunpack.c.l.s4 %v3613_v34 }
  0x4a   :  { %v341_v42 = vunpack.c.0.s8 %v340_v35 }
  0x4c   :  { %269 = vrot.lane.b32.xlu0 %v258_v48, %s3610_s21  ;;  %102 = vrot.lane.b32.xlu1 %v90_v55, %s3605_s30 }
  0x50   :  { %131 = vrot.lane.b32.xlu0 %v119_v60, %s3604_s29  ;;  %160 = vrot.lane.b32.xlu1 %v148_v7, %s3606_s18  ;;  %s3616_s29 = smov 96  }
  0x54   :  { %188 = vrot.lane.b32.xlu0 %v176_v14, %s3607_s0  ;;  %217 = vrot.lane.b32.xlu1 %v205_v17, %s3608_s19 }
  0x58   :  { %246 = vrot.lane.b32.xlu0 %v234_v26, %s3609_s20  ;;  %275 = vrot.lane.b32.xlu1 %v263_v28, %s3610_s21 }
  0x7a   :  { %v122_v11 = vpop.permute.xlu1 %121  ;;  %v93_v18 = vpop.permute.xlu0 %92 }
  0x7b   :  { %v284_v41 = vsel %vm283_vm8, %v3701_v5, %v93_v18  ;;  %v3881_v5 = vsub.s32 %v341_v42, %v3873_v43 }
  0x7c   :  { %v291_v44 = vsel %vm290_vm9, %v284_v41, %v122_v11 }
  0x7e   :  { %v124_v23 = vpop.permute.xlu1 %123  ;;  %v95_v29 = vpop.permute.xlu0 %94 }
  0x7f   :  { %v285_v47 = vsel %vm283_vm8, %v3698_v4, %v95_v29 }
  0x80   :  { %v292_v51 = vsel %vm290_vm9, %v285_v47, %v124_v23 }
  0x82   :  { %v153_v30 = vpop.permute.xlu1 %152  ;;  %v151_v31 = vpop.permute.xlu0 %150 }
  0x83   :  { %v298_v48 = vsel %vm297_vm10, %v291_v44, %v151_v31  ;;  %v299_v56 = vsel %vm297_vm10, %v292_v51, %v153_v30 }
  0x86   :  { %v181_v32 = vpop.permute.xlu1 %180  ;;  %v179_v33 = vpop.permute.xlu0 %178 }
  0x87   :  { %v305_v49 = vsel %vm4683_vm11, %v298_v48, %v179_v33  ;;  %v306_v57 = vsel %vm4683_vm11, %v299_v56, %v181_v32 }
  0x8a   :  { %v210_v37 = vpop.permute.xlu1 %209  ;;  %v208_v38 = vpop.permute.xlu0 %207 }
  0x8b   :  { %v312_v50 = vsel %vm311_vm12, %v305_v49, %v208_v38  ;;  %v313_v60 = vsel %vm311_vm12, %v306_v57, %v210_v37 }
  0x8e   :  { %v239_v45 = vpop.permute.xlu1 %238  ;;  %v237_v46 = vpop.permute.xlu0 %236 }
  0x8f   :  { %v319_v53 = vsel %vm318_vm13, %v312_v50, %v237_v46  ;;  %v320_v61 = vsel %vm318_vm13, %v313_v60, %v239_v45 }
  0x92   :  { %v266_v54 = vpop.permute.xlu1 %265  ;;  %v99_v55 = vpop.permute.xlu0 %98 }
  0x93   :  { %v326_v4 = vsel %vm325_vm14, %v319_v53, %v266_v54  ;;  %v287_v57 = vsel %vm283_vm8, %v3762_v40, %v99_v55 }
  0x94   :  { %v338_v58 = vcombine.high %v326_v4, %v326_v4  ;;  %v345_v59 = vrot.slane %v326_v4, %v3881_v5 }
  0x96   :  { %v352_v62 = vrot.slane %v338_v58, %v3881_v5  ;;  %v353_v63 = vcombine.high %v345_v59, %v345_v59  ;;  %v128_v1 = vpop.permute.xlu1 %127  ;;  %v268_v2 = vpop.permute.xlu0 %267  ;;  %v361_v8 = vrot.slane %v345_v59, %v3881_v5 }
  0x97   :  { %v327_v3 = vsel %vm325_vm14, %v320_v61, %v268_v2  ;;  %v294_v60 = vsel %vm290_vm9, %v287_v57, %v128_v1 }
  0x98   :  { %v354_v7 = vcombine.high %v352_v62, %v352_v62  ;;  %v375_v9 = vrot.slane %v353_v63, %v3881_v5  ;;  %v387_v10 = vcombine.high %v327_v3, %v327_v3  ;;  %v368_v13 = vrot.slane %v352_v62, %v3881_v5 }
  0x99   :  { %v394_v14 = vrot.slane %v327_v3, %v3881_v5 }
  0x9a   :  { %v382_v15 = vrot.slane %v354_v7, %v3881_v5  ;;  %v562_v16 = vcombine.low %v361_v8, %v375_v9  ;;  %v3298_v17 = vcombine.high %v361_v8, %v375_v9  ;;  %v401_v19 = vrot.slane %v387_v10, %v3881_v5  ;;  %v157_v20 = vpop.permute.xlu1 %156  ;;  %v101_v21 = vpop.permute.xlu0 %100 }
  0x9b   :  { %v402_v22 = vcombine.high %v394_v14, %v394_v14  ;;  %v410_v27 = vrot.slane %v394_v14, %v3881_v5  ;;  %v301_v63 = vsel %vm297_vm10, %v294_v60, %v157_v20 }
  0x9c   :  { %v564_v24 = vcombine.low %v368_v13, %v382_v15  ;;  %v3299_v25 = vcombine.high %v368_v13, %v382_v15  ;;  %v403_v26 = vcombine.high %v401_v19, %v401_v19  ;;  %v572_v12 = vrot.slane %v562_v16, %v3881_v5 }
  0x9d   :  { %v424_v28 = vrot.slane %v402_v22, %v3881_v5  ;;  %v579_v11 = vrot.slane %v3298_v17, %v3881_v5  ;;  %v417_v31 = vrot.slane %v401_v19, %v3881_v5  ;;  %v288_v13 = vsel %vm283_vm8, %v3759_v39, %v101_v21 }
  0x9e   :  { %v586_v18 = vrot.slane %v564_v24, %v3881_v5  ;;  %v593_v23 = vrot.slane %v3299_v25, %v3881_v5  ;;  %v185_v29 = vpop.permute.xlu1 %184  ;;  %v130_v30 = vpop.permute.xlu0 %129  ;;  %v431_v32 = vrot.slane %v403_v26, %v3881_v5 }
  0x9f   :  { %v611_v33 = vcombine.low %v410_v27, %v424_v28  ;;  %v3300_v34 = vcombine.high %v410_v27, %v424_v28  ;;  %v594_v45 = vcombine.low %v572_v12, %v579_v11  ;;  %v308_v3 = vsel %vm4683_vm11, %v301_v63, %v185_v29 }
  0xa0   :  { %v595_v35 = vcombine.low %v586_v18, %v593_v23  ;;  %v613_v36 = vcombine.low %v417_v31, %v431_v32  ;;  %v3301_v37 = vcombine.high %v417_v31, %v431_v32  ;;  %v295_v14 = vsel %vm290_vm9, %v288_v13, %v130_v30 }
  0xa1   :  { %v621_v38 = vrot.slane %v611_v33, %v3881_v5  ;;  %v628_v41 = vrot.slane %v3300_v34, %v3881_v5  ;;  %v602_v54 = vrot.slane %v594_v45, %v3881_v5 }
  0xa2   :  { %v214_v42 = vpop.permute.xlu1 %213  ;;  %v159_v44 = vpop.permute.xlu0 %158  ;;  %v635_v46 = vrot.slane %v613_v36, %v3881_v5  ;;  %v642_v47 = vrot.slane %v3301_v37, %v3881_v5  ;;  %v609_v50 = vrot.slane %v595_v35, %v3881_v5 }
  0xa3   :  { %v643_v48 = vcombine.low %v621_v38, %v628_v41  ;;  %v315_v7 = vsel %vm311_vm12, %v308_v3, %v214_v42  ;;  %v302_v20 = vsel %vm297_vm10, %v295_v14, %v159_v44 }
  0xa4   :  { %v644_v49 = vcombine.low %v635_v46, %v642_v47  ;;  %v610_v58 = vcombine.low %v602_v54, %v609_v50 }
  0xa5   :  { %v651_v56 = vrot.slane %v643_v48, %v3881_v5 }
  0xa6   :  { %v243_v51 = vpop.permute.xlu1 %242  ;;  %v187_v53 = vpop.permute.xlu0 %186  ;;  %v658_v4 = vrot.slane %v644_v49, %v3881_v5 }
  0xa7   :  { %v322_v8 = vsel %vm318_vm13, %v315_v7, %v243_v51  ;;  %v309_v22 = vsel %vm4683_vm11, %v302_v20, %v187_v53 }
  0xa8   :  { %v659_v59 = vcombine.low %v651_v56, %v658_v4 }
  0xaa   :  { %v216_v61 = vpop.permute.xlu1 %215  ;;  %v97_v62 = vpop.permute.xlu0 %96  ;;  %v778_v2 = vpack.c.bf16 %v659_v59, %v610_v58 }
  0xab   :  { %v316_v24 = vsel %vm311_vm12, %v309_v22, %v216_v61  ;;  %v286_v12 = vsel %vm283_vm8, %v3704_v6, %v97_v62 }
  0xac   :  { %3462 = vmatmul.mubr.msk.bf16.vlgmr.msra.gmra.mrb[0].mxu0 %vm793_vm15, %v778_v2 }
  0xad   :  { %3465 = vmatprep.mubr.msk.bf16.mxu0 %vm3612_vm7, %v3611_v0 }
  0xae   :  { %v126_v9 = vpop.permute.xlu1 %125  ;;  %v272_v40 = vpop.permute.xlu0 %271 }
  0xaf   :  { %v329_v55 = vsel %vm325_vm14, %v322_v8, %v272_v40  ;;  %v293_v18 = vsel %vm290_vm9, %v286_v12, %v126_v9 }
  0xb0   :  { %v450_v1 = vcombine.high %v329_v55, %v329_v55  ;;  %v457_v10 = vrot.slane %v329_v55, %v3881_v5 }
  0xb2   :  { %v464_v15 = vrot.slane %v450_v1, %v3881_v5  ;;  %v465_v16 = vcombine.high %v457_v10, %v457_v10  ;;  %v155_v17 = vpop.permute.xlu1 %154  ;;  %v245_v19 = vpop.permute.xlu0 %244  ;;  %v473_v23 = vrot.slane %v457_v10, %v3881_v5 }
  0xb3   :  { %v323_v39 = vsel %vm318_vm13, %v316_v24, %v245_v19  ;;  %v300_v29 = vsel %vm297_vm10, %v293_v18, %v155_v17 }
  0xb4   :  { %v466_v25 = vcombine.high %v464_v15, %v464_v15  ;;  %v480_v26 = vrot.slane %v464_v15, %v3881_v5  ;;  %v487_v27 = vrot.slane %v465_v16, %v3881_v5  ;;  %v495_v44 = vcombine.high %v473_v23, %v473_v23 }
  0xb6   :  { %v183_v21 = vpop.permute.xlu1 %182  ;;  %v274_v28 = vpop.permute.xlu0 %273  ;;  %v494_v32 = vrot.slane %v466_v25, %v3881_v5  ;;  %v496_v33 = vcombine.high %v480_v26, %v480_v26  ;;  %v497_v34 = vcombine.high %v487_v27, %v487_v27  ;;  %v661_v7 = vcombine.low %v487_v27, %v495_v44 }
  0xb7   :  { %v330_v11 = vsel %vm325_vm14, %v323_v39, %v274_v28  ;;  %v307_v35 = vsel %vm4683_vm11, %v300_v29, %v183_v21 }
  0xb8   :  { %v499_v30 = vcombine.high %v330_v11, %v330_v11  ;;  %v506_v31 = vrot.slane %v330_v11, %v3881_v5  ;;  %v662_v49 = vcombine.low %v497_v34, %v480_v26  ;;  %v663_v50 = vcombine.low %v494_v32, %v496_v33 }
  0xb9   :  { %v498_v51 = vcombine.high %v494_v32, %v494_v32  ;;  %v677_v20 = vrot.slane %v661_v7, %v3881_v5 }
  0xba   :  { %v212_v36 = vpop.permute.xlu0 %211  ;;  %v241_v37 = vpop.permute.xlu1 %240  ;;  %v513_v6 = vrot.slane %v499_v30, %v3881_v5  ;;  %v514_v38 = vcombine.high %v506_v31, %v506_v31  ;;  %v522_v41 = vrot.slane %v506_v31, %v3881_v5  ;;  %v684_v8 = vrot.slane %v662_v49, %v3881_v5 }
  0xbb   :  { %v314_v42 = vsel %vm311_vm12, %v307_v35, %v212_v36  ;;  %v691_v9 = vrot.slane %v663_v50, %v3881_v5 }
  0xbc   :  { %v515_v45 = vcombine.high %v513_v6, %v513_v6  ;;  %v529_v46 = vrot.slane %v513_v6, %v3881_v5  ;;  %v536_v47 = vrot.slane %v514_v38, %v3881_v5  ;;  %v544_v48 = vcombine.high %v522_v41, %v522_v41 }
  0xbd   :  { %v321_v53 = vsel %vm318_vm13, %v314_v42, %v241_v37  ;;  %v709_v60 = vcombine.low %v498_v51, %v522_v41  ;;  %v693_v25 = vcombine.low %v684_v8, %v691_v9 }
  0xbe   :  { %v270_v54 = vpop.permute.xlu0 %269  ;;  %v103_v56 = vpop.permute.xlu1 %102  ;;  %v543_v4 = vrot.slane %v515_v45, %v3881_v5  ;;  %v545_v57 = vcombine.high %v529_v46, %v529_v46  ;;  %v546_v58 = vcombine.high %v536_v47, %v536_v47  ;;  %v710_v59 = vcombine.low %v536_v47, %v544_v48  ;;  %v3988_v45 = vld [vmem:[%s4671_s2] ss:$0 sm:$0xff]  ;;  %s3614_s2 = smov 32  }
  0xbf   :  { %v328_v61 = vsel %vm325_vm14, %v321_v53, %v270_v54  ;;  %v289_v3 = vsel %vm283_vm8, %v3782_v52, %v103_v56  ;;  %v719_v16 = vrot.slane %v709_v60, %v3881_v5  ;;  %v707_v30 = vrot.slane %v693_v25, %v3881_v5 }
  0xc0   :  { %v711_v62 = vcombine.low %v546_v58, %v529_v46  ;;  %v712_v63 = vcombine.low %v543_v4, %v545_v57  ;;  %v442_v2 = vrot.slane %v328_v61, %v3881_v5  ;;  %v726_v1 = vrot.slane %v710_v59, %v3881_v5  ;;  %v3993_v46 = vld [vmem:[%s4672_s3] ss:$0 sm:$0xff]  ;;  %s3615_s3 = smov 64  }
  0xc1   :  { %v547_v36 = vcombine.high %v543_v4, %v543_v4  ;;  %vm1367_vm8 = vcmask 254976  }
  0xc2   :  { %v132_v40 = vpop.permute.xlu0 %131  ;;  %v161_v55 = vpop.permute.xlu1 %160  ;;  %v733_v10 = vrot.slane %v711_v62, %v3881_v5  ;;  %v740_v13 = vrot.slane %v712_v63, %v3881_v5  ;;  %v449_v14 = vrot.slane %v442_v2, %v3881_v5  ;;  %v741_v26 = vcombine.low %v719_v16, %v726_v1 }
  0xc3   :  { %v296_v15 = vsel %vm290_vm9, %v289_v3, %v132_v40  ;;  %vm1496_vm9 = vcmask 1042434  }
  0xc4   :  { %v742_v52 = vcombine.low %v733_v10, %v740_v13  ;;  %v660_v17 = vcombine.low %v449_v14, %v473_v23  ;;  %v303_v19 = vsel %vm297_vm10, %v296_v15, %v161_v55  ;;  %v749_v31 = vrot.slane %v741_v26, %v3881_v5 }
  0xc5   :  { %vm1498_vm10 = vcmask 1043459  }
  0xc6   :  { %v189_v22 = vpop.permute.xlu0 %188  ;;  %v218_v24 = vpop.permute.xlu1 %217  ;;  %v670_v27 = vrot.slane %v660_v17, %v3881_v5  ;;  %v756_v28 = vrot.slane %v742_v52, %v3881_v5 }
  0xc7   :  { %v310_v39 = vsel %vm4683_vm11, %v303_v19, %v189_v22  ;;  %vm1506_vm11 = vcmask 1047559  }
  0xc8   :  { %v692_v21 = vcombine.low %v670_v27, %v677_v20  ;;  %v317_v12 = vsel %vm311_vm12, %v310_v39, %v218_v24  ;;  %v757_v35 = vcombine.low %v749_v31, %v756_v28  ;;  %vm1500_vm12 = vcmask 1044484  }
  0xca   :  { %v247_v11 = vpop.permute.xlu0 %246  ;;  %v276_v18 = vpop.permute.xlu1 %275  ;;  %v700_v29 = vrot.slane %v692_v21, %v3881_v5 }
  0xcb   :  { %v324_v23 = vsel %vm318_vm13, %v317_v12, %v247_v11  ;;  %vm1502_vm13 = vcmask 1045509  }
  0xcc   :  { %v331_v32 = vsel %vm325_vm14, %v324_v23, %v276_v18  ;;  %v708_v34 = vcombine.low %v700_v29, %v707_v30  ;;  %vm1504_vm14 = vcmask 1046534  }
  0xcd   :  { %v554_v33 = vrot.slane %v331_v32, %v3881_v5 }
  0xce   :  { %v779_v6 = vpack.c.bf16 %v757_v35, %v708_v34 }
  0xcf   :  { %v561_v37 = vrot.slane %v554_v33, %v3881_v5 }
  0xd0   :  { %3466 = vmatmul.mubr.msk.bf16.gmra.mrb[4].mxu0 %vm793_vm15, %v779_v6 }
  0xd1   :  { %v758_v38 = vcombine.low %v547_v36, %v561_v37  ;;  %3469 = vmatprep.mubr.msk.bf16.mxu0 %vm3612_vm7, %v3611_v0 }
  0xd3   :  { %v765_v41 = vrot.slane %v758_v38, %v3881_v5 }
  0xd5   :  { %v772_v42 = vrot.slane %v765_v41, %v3881_v5 }
  0xd7   :  { %v780_v44 = vpack.c.bf16 %v772_v42, %v772_v42 }
  0xd9   :  { %3470 = vmatmul.mubr.msk.bf16.gmra.mrb[8].mxu0 %vm793_vm15, %v780_v44 }
 0x17f   :  { %v837_v47 = vpop.f32.mrb[0].mxu0 }
 0x180   :  { %v865_v48 = vmul.f32 %v3988_v45, %v837_v47  ;;  %v3463_v49 = vpop.f32.mrb[1].mxu0 }
 0x181   :  { %v840_v50 = vpop.f32.mrb[2].mxu0 }
 0x182   :  { %v876_v51 = vadd.f32 %v3993_v46, %v865_v48  ;;  %v866_v53 = vmul.f32 %v3988_v45, %v840_v50  ;;  %v3464_v54 = vpop.f32.mrb[3].mxu0 }
 0x184   :  { %v881_v56 = vmax.f32 %v876_v51, 0.0  ;;  %v877_v4 = vadd.f32 %v3993_v46, %v866_v53 }
 0x186   :  { %v891_v57 = vcombine.high %v881_v56, %v881_v56  ;;  %v898_v58 = vrot.slane %v881_v56, %v3881_v5  ;;  %v882_v59 = vmax.f32 %v877_v4, 0.0 }
 0x188   :  { %v905_v60 = vrot.slane %v891_v57, %v3881_v5  ;;  %v906_v61 = vcombine.high %v898_v58, %v898_v58  ;;  %v4002_v62 = vrot.slane %v898_v58, %v3881_v5  ;;  %v940_v63 = vcombine.high %v882_v59, %v882_v59 }
 0x189   :  { %v947_v2 = vrot.slane %v882_v59, %v3881_v5 }
 0x18a   :  { %v907_v3 = vcombine.high %v905_v60, %v905_v60  ;;  %v921_v7 = vrot.slane %v905_v60, %v3881_v5  ;;  %v928_v8 = vrot.slane %v906_v61, %v3881_v5  ;;  %v936_v9 = vcombine.high %v4002_v62, %v4002_v62 }
 0x18b   :  { %v954_v40 = vrot.slane %v940_v63, %v3881_v5  ;;  %v955_v55 = vcombine.high %v947_v2, %v947_v2  ;;  %v963_v1 = vrot.slane %v947_v2, %v3881_v5 }
 0x18c   :  { %v935_v10 = vrot.slane %v907_v3, %v3881_v5  ;;  %v937_v13 = vcombine.high %v921_v7, %v921_v7  ;;  %v938_v14 = vcombine.high %v928_v8, %v928_v8  ;;  %v1111_v15 = vcombine.low %v928_v8, %v936_v9 }
 0x18d   :  { %v956_v16 = vcombine.high %v954_v40, %v954_v40  ;;  %v970_v52 = vrot.slane %v954_v40, %v3881_v5  ;;  %v977_v17 = vrot.slane %v955_v55, %v3881_v5  ;;  %v985_v19 = vcombine.high %v963_v1, %v963_v1 }
 0x18e   :  { %v1118_v20 = vrot.slane %v1111_v15, %v3881_v5  ;;  %v1126_v22 = vcombine.low %v938_v14, %v921_v7  ;;  %v1141_v24 = vcombine.low %v935_v10, %v937_v13  ;;  %v939_v25 = vcombine.high %v935_v10, %v935_v10 }
 0x18f   :  { %v4016_v26 = vrot.slane %v956_v16, %v3881_v5  ;;  %v986_v27 = vcombine.high %v970_v52, %v970_v52  ;;  %v987_v39 = vcombine.high %v977_v17, %v977_v17  ;;  %v1171_v21 = vcombine.low %v977_v17, %v985_v19 }
 0x190   :  { %v1125_v28 = vrot.slane %v1118_v20, %v3881_v5  ;;  %v1133_v12 = vrot.slane %v1126_v22, %v3881_v5  ;;  %v1148_v11 = vrot.slane %v1141_v24, %v3881_v5  ;;  %v1156_v18 = vcombine.low %v939_v25, %v963_v1 }
 0x191   :  { %v1178_v23 = vrot.slane %v1171_v21, %v3881_v5  ;;  %v1186_v29 = vcombine.low %v987_v39, %v970_v52  ;;  %v1201_v30 = vcombine.low %v4016_v26, %v986_v27 }
 0x192   :  { %v1140_v31 = vrot.slane %v1133_v12, %v3881_v5  ;;  %v1155_v32 = vrot.slane %v1148_v11, %v3881_v5  ;;  %v1368_v33 = vsel %vm1367_vm8, %v1125_v28, -inf  ;;  %v1163_v34 = vrot.slane %v1156_v18, %v3881_v5 }
 0x193   :  { %v1369_v35 = vrot.slane %v1368_v33, 4  ;;  %v1185_v36 = vrot.slane %v1178_v23, %v3881_v5  ;;  %v1193_v37 = vrot.slane %v1186_v29, %v3881_v5  ;;  %v1208_v6 = vrot.slane %v1201_v30, %v3881_v5 }
 0x194   :  { %v1375_v38 = vsel %vm1367_vm8, %v1140_v31, -inf  ;;  %v1382_v41 = vsel %vm1367_vm8, %v1155_v32, -inf  ;;  %v1170_v42 = vrot.slane %v1163_v34, %v3881_v5 }
 0x195   :  { %v1370_v44 = vmax.f32 %v1368_v33, %v1369_v35  ;;  %v1376_v47 = vrot.slane %v1375_v38, 4  ;;  %v1383_v48 = vrot.slane %v1382_v41, 4  ;;  %v1200_v49 = vrot.slane %v1193_v37, %v3881_v5 }
 0x196   :  { %v1215_v50 = vrot.slane %v1208_v6, %v3881_v5  ;;  %v1389_v51 = vsel %vm1367_vm8, %v1170_v42, -inf  ;;  %v1396_v53 = vsel %vm1367_vm8, %v1185_v36, -inf }
 0x197   :  { %v1371_v54 = vrot.slane %v1370_v44, 2  ;;  %v1377_v56 = vmax.f32 %v1375_v38, %v1376_v47  ;;  %v1384_v4 = vmax.f32 %v1382_v41, %v1383_v48  ;;  %v1390_v57 = vrot.slane %v1389_v51, 4 }
 0x198   :  { %v1397_v58 = vrot.slane %v1396_v53, 4  ;;  %v1403_v59 = vsel %vm1367_vm8, %v1200_v49, -inf  ;;  %v1410_v60 = vsel %vm1367_vm8, %v1215_v50, -inf }
 0x199   :  { %v1372_v61 = vmax.f32 %v1370_v44, %v1371_v54  ;;  %v1378_v63 = vrot.slane %v1377_v56, 2  ;;  %v1385_v2 = vrot.slane %v1384_v4, 2  ;;  %v1391_v3 = vmax.f32 %v1389_v51, %v1390_v57 }
 0x19a   :  { %v1398_v7 = vmax.f32 %v1396_v53, %v1397_v58  ;;  %v1404_v8 = vrot.slane %v1403_v59, 4  ;;  %v1411_v9 = vrot.slane %v1410_v60, 4 }
 0x19b   :  { %v1373_v40 = vrot.slane %v1372_v61, 1  ;;  %v1379_v55 = vmax.f32 %v1377_v56, %v1378_v63  ;;  %v1386_v1 = vmax.f32 %v1384_v4, %v1385_v2  ;;  %v1392_v10 = vrot.slane %v1391_v3, 2 }
 0x19c   :  { %v1399_v13 = vrot.slane %v1398_v7, 2  ;;  %v1405_v14 = vmax.f32 %v1403_v59, %v1404_v8  ;;  %v1412_v15 = vmax.f32 %v1410_v60, %v1411_v9  ;;  %v988_v4 = vcombine.high %v4016_v26, %v4016_v26 }
 0x19d   :  { %v1380_v16 = vrot.slane %v1379_v55, 1  ;;  %v1387_v52 = vrot.slane %v1386_v1, 1  ;;  %v1393_v17 = vmax.f32 %v1391_v3, %v1392_v10  ;;  %v1374_v24 = vmax.f32 %v1372_v61, %v1373_v40 }
 0x19e   :  { %v1400_v19 = vmax.f32 %v1398_v7, %v1399_v13  ;;  %v1406_v20 = vrot.slane %v1405_v14, 2  ;;  %v1413_v22 = vrot.slane %v1412_v15, 2 }
 0x19f   :  { %v1381_v25 = vmax.f32 %v1379_v55, %v1380_v16  ;;  %v1388_v27 = vmax.f32 %v1386_v1, %v1387_v52  ;;  %v1394_v39 = vrot.slane %v1393_v17, 1 }
 0x1a0   :  { %v1401_v21 = vrot.slane %v1400_v19, 1  ;;  %v1407_v28 = vmax.f32 %v1405_v14, %v1406_v20  ;;  %v1414_v12 = vmax.f32 %v1412_v15, %v1413_v22 }
 0x1a1   :  { %v1497_v11 = vsel %vm1496_vm9, %v1381_v25, %v1374_v24  ;;  %v1395_v18 = vmax.f32 %v1393_v17, %v1394_v39 }
 0x1a2   :  { %v1402_v23 = vmax.f32 %v1400_v19, %v1401_v21  ;;  %v1408_v29 = vrot.slane %v1407_v28, 1  ;;  %v1415_v30 = vrot.slane %v1414_v12, 1  ;;  %v1499_v31 = vsel %vm1498_vm10, %v1388_v27, %v1497_v11 }
 0x1a3   :  { %v1501_v32 = vsel %vm1500_vm12, %v1395_v18, %v1499_v31  ;;  %v845_v33 = vpop.f32.mrb[4].mxu0 }
 0x1a4   :  { %v1409_v34 = vmax.f32 %v1407_v28, %v1408_v29  ;;  %v1503_v35 = vsel %vm1502_vm13, %v1402_v23, %v1501_v32  ;;  %v867_v36 = vmul.f32 %v3988_v45, %v845_v33  ;;  %v3467_v37 = vpop.f32.mrb[5].mxu0  ;;  %v1416_v6 = vmax.f32 %v1414_v12, %v1415_v30 }
 0x1a5   :  { %v848_v38 = vpop.f32.mrb[6].mxu0 }
 0x1a6   :  { %v1505_v41 = vsel %vm1504_vm14, %v1409_v34, %v1503_v35  ;;  %v878_v42 = vadd.f32 %v3993_v46, %v867_v36  ;;  %v868_v44 = vmul.f32 %v3988_v45, %v848_v38  ;;  %v3468_v47 = vpop.f32.mrb[7].mxu0 }
 0x1a7   :  { %v1507_v48 = vsel %vm1506_vm11, %v1416_v6, %v1505_v41 }
 0x1a8   :  { %v883_v49 = vmax.f32 %v878_v42, 0.0  ;;  %v879_v50 = vadd.f32 %v3993_v46, %v868_v44  ;;  %v4051_v51 = vsel %vm254_vm6, %v4002_v62, %v1507_v48 }
 0x1aa   :  { %v989_v53 = vcombine.high %v883_v49, %v883_v49  ;;  %v996_v54 = vrot.slane %v883_v49, %v3881_v5  ;;  %v884_v56 = vmax.f32 %v879_v50, 0.0 }
 0x1ac   :  { %v853_v57 = vpop.f32.mrb[8].mxu0  ;;  %v1003_v58 = vrot.slane %v989_v53, %v3881_v5  ;;  %v1004_v59 = vcombine.high %v996_v54, %v996_v54  ;;  %v1012_v60 = vrot.slane %v996_v54, %v3881_v5  ;;  %v1038_v61 = vcombine.high %v884_v56, %v884_v56 }
 0x1ad   :  { %v3471_v63 = vpop.f32.mrb[9].mxu0  ;;  %v1045_v2 = vrot.slane %v884_v56, %v3881_v5  ;;  %v869_v62 = vmul.f32 %v3988_v45, %v853_v57 }
 0x1ae   :  { %v856_v3 = vpop.f32.mrb[10].mxu0  ;;  %v1005_v7 = vcombine.high %v1003_v58, %v1003_v58  ;;  %v4061_v8 = vrot.slane %v1004_v59, %v3881_v5  ;;  %v1216_v9 = vcombine.low %v988_v4, %v1012_v60  ;;  %v1019_v26 = vrot.slane %v1003_v58, %v3881_v5 }
 0x1af   :  { %v3472_v40 = vpop.f32.mrb[11].mxu0  ;;  %v1052_v55 = vrot.slane %v1038_v61, %v3881_v5  ;;  %v1053_v1 = vcombine.high %v1045_v2, %v1045_v2  ;;  %v880_v10 = vadd.f32 %v3993_v46, %v869_v62  ;;  %v1061_v15 = vrot.slane %v1045_v2, %v3881_v5 }
 0x1b0   :  { %v1033_v13 = vrot.slane %v1005_v7, %v3881_v5  ;;  %v1223_v14 = vrot.slane %v1216_v9, %v3881_v5  ;;  %v3309_v45 = vcombine.high %v1012_v60, %v4061_v8 }
 0x1b1   :  { %v1054_v16 = vcombine.high %v1052_v55, %v1052_v55  ;;  %v1068_v52 = vrot.slane %v1052_v55, %v3881_v5  ;;  %v1075_v17 = vrot.slane %v1053_v1, %v3881_v5  ;;  %v885_v19 = vmax.f32 %v880_v10, 0.0 }
 0x1b2   :  { %v1230_v20 = vrot.slane %v1223_v14, %v3881_v5  ;;  %v1238_v22 = vrot.slane %v3309_v45, %v3881_v5  ;;  %v1246_v24 = vcombine.low %v1019_v26, %v1033_v13  ;;  %v3310_v46 = vcombine.high %v1019_v26, %v1033_v13 }
 0x1b3   :  { %v1082_v25 = vrot.slane %v1054_v16, %v3881_v5  ;;  %v1276_v27 = vcombine.low %v1061_v15, %v1075_v17  ;;  %v3311_v39 = vcombine.high %v1061_v15, %v1075_v17  ;;  %v4076_v21 = vrot.slane %v885_v19, %v3881_v5 }
 0x1b4   :  { %v1245_v28 = vrot.slane %v1238_v22, %v3881_v5  ;;  %v1253_v12 = vrot.slane %v1246_v24, %v3881_v5  ;;  %v1268_v11 = vrot.slane %v3310_v46, %v3881_v5  ;;  %v1417_v18 = vsel %vm1367_vm8, %v1230_v20, -inf }
 0x1b5   :  { %v1418_v23 = vrot.slane %v1417_v18, 4  ;;  %v1283_v29 = vrot.slane %v1276_v27, %v3881_v5  ;;  %v1298_v30 = vrot.slane %v3311_v39, %v3881_v5  ;;  %v1306_v31 = vcombine.low %v1068_v52, %v1082_v25 }
 0x1b6   :  { %v1260_v32 = vrot.slane %v1253_v12, %v3881_v5  ;;  %v1275_v33 = vrot.slane %v1268_v11, %v3881_v5  ;;  %v1424_v34 = vsel %vm1367_vm8, %v1245_v28, -inf  ;;  %v3312_v35 = vcombine.high %v1068_v52, %v1082_v25 }
 0x1b7   :  { %v1419_v36 = vmax.f32 %v1417_v18, %v1418_v23  ;;  %v1425_v37 = vrot.slane %v1424_v34, 4  ;;  %v1290_v6 = vrot.slane %v1283_v29, %v3881_v5  ;;  %v1305_v38 = vrot.slane %v1298_v30, %v3881_v5 }
 0x1b8   :  { %v1431_v41 = vsel %vm1367_vm8, %v1260_v32, -inf  ;;  %v1438_v42 = vsel %vm1367_vm8, %v1275_v33, -inf  ;;  %v1313_v44 = vrot.slane %v1306_v31, %v3881_v5  ;;  %v1328_v47 = vrot.slane %v3312_v35, %v3881_v5 }
 0x1b9   :  { %v1420_v48 = vrot.slane %v1419_v36, 2  ;;  %v1426_v49 = vmax.f32 %v1424_v34, %v1425_v37  ;;  %v1432_v50 = vrot.slane %v1431_v41, 4  ;;  %v1439_v53 = vrot.slane %v1438_v42, 4 }
 0x1ba   :  { %v1320_v54 = vrot.slane %v1313_v44, %v3881_v5  ;;  %v1335_v56 = vrot.slane %v1328_v47, %v3881_v5  ;;  %v1445_v4 = vsel %vm1367_vm8, %v1290_v6, -inf  ;;  %v1452_v57 = vsel %vm1367_vm8, %v1305_v38, -inf }
 0x1bb   :  { %v1421_v58 = vmax.f32 %v1419_v36, %v1420_v48  ;;  %v1427_v59 = vrot.slane %v1426_v49, 2  ;;  %v1433_v60 = vmax.f32 %v1431_v41, %v1432_v50  ;;  %v1440_v61 = vmax.f32 %v1438_v42, %v1439_v53 }
 0x1bc   :  { %v1446_v63 = vrot.slane %v1445_v4, 4  ;;  %v1453_v2 = vrot.slane %v1452_v57, 4  ;;  %v1459_v62 = vsel %vm1367_vm8, %v1320_v54, -inf  ;;  %v1466_v3 = vsel %vm1367_vm8, %v1335_v56, -inf }
 0x1bd   :  { %v1422_v7 = vrot.slane %v1421_v58, 1  ;;  %v1428_v9 = vmax.f32 %v1426_v49, %v1427_v59  ;;  %v1434_v40 = vrot.slane %v1433_v60, 2  ;;  %v1441_v26 = vrot.slane %v1440_v61, 2 }
 0x1be   :  { %v1447_v55 = vmax.f32 %v1445_v4, %v1446_v63  ;;  %v1454_v1 = vmax.f32 %v1452_v57, %v1453_v2  ;;  %v1460_v10 = vrot.slane %v1459_v62, 4  ;;  %v1467_v13 = vrot.slane %v1466_v3, 4 }
 0x1bf   :  { %v1423_v14 = vmax.f32 %v1421_v58, %v1422_v7  ;;  %v1429_v45 = vrot.slane %v1428_v9, 1  ;;  %v1435_v15 = vmax.f32 %v1433_v60, %v1434_v40  ;;  %v1442_v16 = vmax.f32 %v1440_v61, %v1441_v26 }
 0x1c0   :  { %v1448_v52 = vrot.slane %v1447_v55, 2  ;;  %v1455_v17 = vrot.slane %v1454_v1, 2  ;;  %v1461_v19 = vmax.f32 %v1459_v62, %v1460_v10  ;;  %v1468_v20 = vmax.f32 %v1466_v3, %v1467_v13  ;;  %v3504_v13 = vld [vmem:[%s4673_s4 + $0x40] sm:$0xff]  }
 0x1c1   :  { %v1436_v22 = vrot.slane %v1435_v15, 1  ;;  %v1443_v24 = vrot.slane %v1442_v16, 1  ;;  %v1555_v46 = vrot.slane %v1423_v14, 4  ;;  %v1554_v25 = vrot.slane %v4051_v51, 4  ;;  %v3505_v14 = vld [vmem:[%s4673_s4] sm:$0xff]   ;;  %3380 = vmatprep.subr.bf16.mxu1 %v3504_v13 }
 0x1c2   :  { %v1449_v27 = vmax.f32 %v1447_v55, %v1448_v52  ;;  %v1456_v39 = vmax.f32 %v1454_v1, %v1455_v17  ;;  %v1462_v28 = vrot.slane %v1461_v19, 2  ;;  %v1469_v12 = vrot.slane %v1468_v20, 2  ;;  %3381 = vmatpush3.bf16.msra.mxu1 %v3505_v14 }
 0x1c3   :  { %v1430_v11 = vmax.f32 %v1428_v9, %v1429_v45  ;;  %v1437_v18 = vmax.f32 %v1435_v15, %v1436_v22  ;;  %v1444_v23 = vmax.f32 %v1442_v16, %v1443_v24  ;;  %v1094_v29 = vcombine.high %v4076_v21, %v4076_v21  ;;  %v3507_v22 = vld [vmem:[%s4673_s4 + $0x8] sm:$0xff]  }
 0x1c4   :  { %v1450_v30 = vrot.slane %v1449_v27, 1  ;;  %v1457_v31 = vrot.slane %v1456_v39, 1  ;;  %v1463_v32 = vmax.f32 %v1461_v19, %v1462_v28  ;;  %v1470_v33 = vmax.f32 %v1468_v20, %v1469_v12  ;;  %v3506_v20 = vld [vmem:[%s4673_s4 + $0x48] sm:$0xff]   ;;  %v3508_v12 = vld [vmem:[%s4673_s4 + $0x50] sm:$0xff]  }
 0x1c5   :  { %v1508_v34 = vsel %vm1496_vm9, %v1437_v18, %v1430_v11  ;;  %v1101_v35 = vrot.slane %v4076_v21, %v3881_v5  ;;  %v1108_v51 = vrot.slane %v1094_v29, %v3881_v5  ;;  %v1556_v36 = vsel %vm60_vm0, %v1554_v25, %v1555_v46  ;;  %3382 = vmatprep.subr.bf16.mxu1 %v3506_v20  ;;  %v3509_v11 = vld [vmem:[%s4673_s4 + $0x10] sm:$0xff]  }
 0x1c6   :  { %v1509_v37 = vsel %vm1498_vm10, %v1444_v23, %v1508_v34  ;;  %v1451_v6 = vmax.f32 %v1449_v27, %v1450_v30  ;;  %v1464_v38 = vrot.slane %v1463_v32, 1  ;;  %v1458_v41 = vmax.f32 %v1456_v39, %v1457_v31  ;;  %3383 = vmatpush3.bf16.msra.mxu1 %v3507_v22  ;;  %v3510_v34 = vld [vmem:[%s4673_s4 + $0x58] sm:$0xff]  }
 0x1c7   :  { %v1471_v42 = vrot.slane %v1470_v33, 1  ;;  %v1336_v44 = vcombine.low %v1101_v35, %v1108_v51  ;;  %v4109_v47 = vsel %vm139_vm3, %v1556_v36, 0.0  ;;  %v4124_v61 = vsel %vm60_vm0, 0.0, %v1554_v25  ;;  %3384 = vmatprep.subr.bf16.mxu1 %v3508_v12  ;;  %v3511_v35 = vld [vmem:[%s4673_s4 + $0x18] sm:$0xff]  }
 0x1c8   :  { %v1465_v48 = vmax.f32 %v1463_v32, %v1464_v38  ;;  %v1510_v49 = vsel %vm1500_vm12, %v1451_v6, %v1509_v37  ;;  %v1637_v50 = vrot.slane %v4109_v47, 5  ;;  %v1573_v21 = vrot.slane %v4109_v47, 1 }
 0x1c9   :  { %v1472_v53 = vmax.f32 %v1470_v33, %v1471_v42  ;;  %v1511_v54 = vsel %vm1502_vm13, %v1458_v41, %v1510_v49  ;;  %v1343_v56 = vrot.slane %v1336_v44, %v3881_v5  ;;  %v1655_v59 = vrot.slane %v4109_v47, 6 }
 0x1ca   :  { %v1512_v4 = vsel %vm1504_vm14, %v1465_v48, %v1511_v54  ;;  %1644 = vrot.lane.b32.xlu1 %v1637_v50, %s3614_s2  ;;  %1580 = vrot.lane.b32.xlu0 %v1573_v21, %s3614_s2  ;;  %v1591_v60 = vrot.slane %v4109_v47, 2  ;;  %v1609_v62 = vrot.slane %v4109_v47, 3  ;;  %v1608_v7 = vrot.slane %v4124_v61, 3  ;;  %v3513_v54 = vld [vmem:[%s4673_s4 + $0x20] sm:$0xff]  }
 0x1cb   :  { %v1513_v57 = vsel %vm1506_vm11, %v1472_v53, %v1512_v4  ;;  %v1350_v58 = vrot.slane %v1343_v56, %v3881_v5  ;;  %v1674_v26 = vrot.slane %v4109_v47, 7  ;;  %v4136_v55 = vrot.slane %v3611_v0, 7  ;;  %3385 = vmatpush3.bf16.msra.mxu1 %v3509_v11  ;;  %v3512_v53 = vld [vmem:[%s4673_s4 + $0x60] sm:$0xff]   ;;  %v3514_v56 = vld [vmem:[%s4673_s4 + $0x68] sm:$0xff]  }
 0x1cc   :  { %v1517_v63 = vsel %vm254_vm6, %v4061_v8, %v1513_v57  ;;  %v1610_v40 = vsel %vm139_vm3, %v1608_v7, %v1609_v62  ;;  %v1572_v1 = vrot.slane %v4124_v61, 1  ;;  %v1636_v17 = vrot.slane %v4124_v61, 5  ;;  %3386 = vmatprep.subr.bf16.mxu1 %v3510_v34 }
 0x1cd   :  { %v1473_v2 = vsel %vm1367_vm8, %v1350_v58, -inf  ;;  %v1677_v45 = vsel %vm254_vm6, %v1674_v26, %v4136_v55  ;;  %v1557_v16 = vrot.slane %v1517_v63, 4  ;;  %v1590_v27 = vrot.slane %v4124_v61, 2  ;;  %vm2047_vm8 = vmor %vm254_vm6, %vm1496_vm9 }
 0x1ce   :  { %v1474_v3 = vrot.slane %v1473_v2, 4  ;;  %1662 = vrot.lane.b32.xlu1 %v1655_v59, %s3615_s3  ;;  %1598 = vrot.lane.b32.xlu0 %v1591_v60, %s3615_s3  ;;  %v1574_v15 = vsel %vm81_vm2, %v1572_v1, %v1573_v21  ;;  %v1638_v24 = vsel %vm196_vm4, %v1636_v17, %v1637_v50  ;;  %v1654_v30 = vrot.slane %v4124_v61, 6  ;;  %vm2048_vm13 = vmor %vm2047_vm8, %vm1500_vm12 }
 0x1cf   :  { %v4161_v46 = vsel %vm60_vm0, 0.0, %v1557_v16  ;;  %v1592_v23 = vsel %vm110_vm1, %v1590_v27, %v1591_v60  ;;  %v1673_v36 = vrot.slane %v4124_v61, 7  ;;  %3387 = vmatpush3.bf16.msra.mxu1 %v3511_v35  ;;  %v3516_v60 = vld [vmem:[%s4673_s4 + $0x70] sm:$0xff]   ;;  %v3617_v17 = vmov 1983009808  }
 0x1d0   :  { %v1475_v9 = vmax.f32 %v1473_v2, %v1474_v3  ;;  %v1575_v28 = vrot.slane %v4161_v46, 1  ;;  %v1639_v32 = vrot.slane %v4161_v46, 5  ;;  %v1656_v51 = vsel %vm225_vm5, %v1654_v30, %v1655_v59  ;;  %3388 = vmatprep.subr.bf16.mxu1 %v3512_v53  ;;  %v3515_v59 = vld [vmem:[%s4673_s4 + $0x28] sm:$0xff]   ;;  %v3517_v2 = vld [vmem:[%s4673_s4 + $0x30] sm:$0xff]   ;;  %v3519_v3 = vld [vmem:[%s4673_s4 + $0x38] sm:$0xff]  }
 0x1d1   :  { %v1593_v6 = vrot.slane %v4161_v46, 2  ;;  %v1675_v41 = vsel %vm254_vm6, %v1673_v36, %v1674_v26  ;;  %v1611_v42 = vrot.slane %v4161_v46, 3  ;;  %v1657_v49 = vrot.slane %v4161_v46, 6 }
 0x1d2   :  { %v1476_v8 = vrot.slane %v1475_v9, 2  ;;  %1614 = vrot.lane.b32.xlu1 %v1610_v40, %s3616_s29  ;;  %1616 = vrot.lane.b32.xlu0 %v1609_v62, %s3616_s29  ;;  %v1678_v57 = vrot.slane %v4161_v46, 7  ;;  %v3518_v62 = vld [vmem:[%s4673_s4 + $0x78] sm:$0xff]   ;;  %v1626_v20 = vrot.slane %v4124_v61, 4  ;;  %vm1703_vm11 = vcmask 785408  }
 0x1d3   :  { %3389 = vmatpush3.bf16.msra.mxu1 %v3513_v54  ;;  %v1629_v34 = vrot.slane %v4161_v46, 4  ;;  %vm2084_vm8 = vcmask 517120  }
 0x1d4   :  { %v1477_v10 = vmax.f32 %v1475_v9, %v1476_v8  ;;  %3390 = vmatprep.subr.bf16.mxu1 %v3514_v56 }
 0x1d6   :  { %v1478_v52 = vrot.slane %v1477_v10, 1  ;;  %1684 = vrot.lane.b32.xlu1 %v1677_v45, %s3616_s29  ;;  %1578 = vrot.lane.b32.xlu0 %v1574_v15, %s3614_s2 }
 0x1d7   :  { %3391 = vmatpush3.bf16.msra.mxu1 %v3515_v59 }
 0x1d8   :  { %v1479_v19 = vmax.f32 %v1477_v10, %v1478_v52  ;;  %3392 = vmatprep.subr.bf16.mxu1 %v3516_v60 }
 0x1da   :  { %v1558_v25 = vrot.slane %v1479_v19, 4  ;;  %1642 = vrot.lane.b32.xlu0 %v1638_v24, %s3614_s2  ;;  %v1731_v19 = vunpack.c.l.s4 %v3617_v17 }
 0x1db   :  { %3393 = vmatpush3.bf16.msra.mxu1 %v3517_v2 }
 0x1dc   :  { %v1559_v39 = vsel %vm60_vm0, %v1557_v16, %v1558_v25  ;;  %3394 = vmatprep.subr.bf16.mxu1 %v3518_v62  ;;  %v1627_v16 = vrot.slane %v4109_v47, 4 }
 0x1dd   :  { %v4174_v18 = vsel %vm139_vm3, %v1559_v39, 0.0 }
 0x1de   :  { %v1576_v29 = vrot.slane %v4174_v18, 1  ;;  %1596 = vrot.lane.b32.xlu0 %v1592_v23, %s3615_s3  ;;  %v1640_v33 = vrot.slane %v4174_v18, 5  ;;  %v1594_v38 = vrot.slane %v4174_v18, 2  ;;  %v1612_v44 = vrot.slane %v4174_v18, 3 }
 0x1df   :  { %v1658_v50 = vrot.slane %v4174_v18, 6  ;;  %v1679_v58 = vrot.slane %v4174_v18, 7  ;;  %3395 = vmatpush3.bf16.msra.mxu1 %v3519_v3  ;;  %v1628_v24 = vsel %vm60_vm0, %v1626_v20, %v1627_v16  ;;  %v1630_v35 = vrot.slane %v4174_v18, 4 }
 0x1e0   :  { %v1577_v31 = vsel %vm81_vm2, %v1575_v28, %v1576_v29  ;;  %v1641_v37 = vsel %vm196_vm4, %v1639_v32, %v1640_v33  ;;  %v1595_v48 = vsel %vm110_vm1, %v1593_v6, %v1594_v38  ;;  %v1613_v21 = vsel %vm139_vm3, %v1611_v42, %v1612_v44 }
 0x1e1   :  { %1582 = vrot.lane.b32.xlu1 %v1577_v31, %s3614_s2  ;;  %v1659_v4 = vsel %vm225_vm5, %v1657_v49, %v1658_v50  ;;  %v1680_v63 = vsel %vm254_vm6, %v1678_v57, %v1679_v58  ;;  %v1681_v7 = vsel %vm254_vm6, %v1679_v58, %v4136_v55  ;;  %vm1698_vm2 = vcmask 523264  }
 0x1e2   :  { %1660 = vrot.lane.b32.xlu0 %v1656_v51, %s3615_s3  ;;  %v1732_v28 = vunpack.c.0.s8 %v1731_v19 }
 0x1e5   :  { %1646 = vrot.lane.b32.xlu1 %v1641_v37, %s3614_s2 }
 0x1e6   :  { %1682 = vrot.lane.b32.xlu0 %v1675_v41, %s3616_s29 }
 0x1e9   :  { %1600 = vrot.lane.b32.xlu1 %v1595_v48, %s3615_s3 }
 0x1ea   :  { %1618 = vrot.lane.b32.xlu0 %v1613_v21, %s3616_s29  ;;  %v1631_v21 = vsel %vm60_vm0, %v1629_v34, %v1630_v35 }
 0x1ed   :  { %1664 = vrot.lane.b32.xlu1 %v1659_v4, %s3615_s3 }
 0x1ee   :  { %1584 = vrot.lane.b32.xlu0 %v1576_v29, %s3614_s2 }
 0x1f1   :  { %1686 = vrot.lane.b32.xlu1 %v1680_v63, %s3616_s29 }
 0x1f2   :  { %1602 = vrot.lane.b32.xlu0 %v1594_v38, %s3615_s3 }
 0x1f5   :  { %1648 = vrot.lane.b32.xlu1 %v1640_v33, %s3614_s2 }
 0x1f6   :  { %1620 = vrot.lane.b32.xlu0 %v1612_v44, %s3616_s29 }
 0x1f9   :  { %1666 = vrot.lane.b32.xlu1 %v1658_v50, %s3615_s3 }
 0x1fd   :  { %1688 = vrot.lane.b32.xlu1 %v1681_v7, %s3616_s29 }
 0x23c   :  { %v1645_v9 = vpop.permute.xlu1 %1644  ;;  %v1581_v40 = vpop.permute.xlu0 %1580 }
 0x23d   :  { %v1709_v51 = vsel %vm793_vm15, %v1627_v16, %v1645_v9  ;;  %v1695_v6 = vsel %vm793_vm15, %v4109_v47, %v1581_v40 }
 0x240   :  { %v1599_v26 = vpop.permute.xlu0 %1598  ;;  %v1663_v8 = vpop.permute.xlu1 %1662 }
 0x241   :  { %v1713_v38 = vsel %vm1698_vm2, %v1709_v51, %v1663_v8  ;;  %v1700_v42 = vsel %vm1698_vm2, %v1695_v6, %v1599_v26 }
 0x244   :  { %v1617_v1 = vpop.permute.xlu0 %1616  ;;  %v1615_v10 = vpop.permute.xlu1 %1614 }
 0x245   :  { %v1705_v50 = vsel %vm1703_vm11, %v1700_v42, %v1617_v1 }
 0x248   :  { %v1579_v13 = vpop.permute.xlu0 %1578  ;;  %v1685_v45 = vpop.permute.xlu1 %1684 }
 0x249   :  { %v1694_v22 = vsel %vm793_vm15, %v4124_v61, %v1579_v13  ;;  %v4256_v61 = vsub.s32 %v1732_v28, %v3873_v43  ;;  %v1717_v44 = vsel %vm1703_vm11, %v1713_v38, %v1685_v45 }
 0x24a   :  { %v1746_v57 = vcombine.low %v1705_v50, %v1717_v44 }
 0x24c   :  { %v1643_v14 = vpop.permute.xlu0 %1642  ;;  %v1753_v7 = vrot.slane %v1746_v57, %v4256_v61 }
 0x24d   :  { %v1708_v27 = vsel %vm793_vm15, %v1628_v24, %v1643_v14 }
 0x250   :  { %v1597_v15 = vpop.permute.xlu0 %1596 }
 0x251   :  { %v1699_v25 = vsel %vm1698_vm2, %v1694_v22, %v1597_v15 }
 0x252   :  { %v1704_v23 = vsel %vm1703_vm11, %v1699_v25, %v1615_v10 }
 0x253   :  { %v1583_v52 = vpop.permute.xlu1 %1582 }
 0x254   :  { %v1661_v55 = vpop.permute.xlu0 %1660  ;;  %v1696_v48 = vsel %vm793_vm15, %v4161_v46, %v1583_v52 }
 0x255   :  { %v1712_v12 = vsel %vm1698_vm2, %v1708_v27, %v1661_v55 }
 0x257   :  { %v1647_v39 = vpop.permute.xlu1 %1646 }
 0x258   :  { %v1683_v11 = vpop.permute.xlu0 %1682  ;;  %v1710_v54 = vsel %vm793_vm15, %v1631_v21, %v1647_v39 }
 0x259   :  { %v1716_v29 = vsel %vm1703_vm11, %v1712_v12, %v1683_v11 }
 0x25a   :  { %v1728_v30 = vcombine.low %v1704_v23, %v1716_v29  ;;  %v1729_v31 = vcombine.high %v1704_v23, %v1716_v29 }
 0x25b   :  { %v1601_v32 = vpop.permute.xlu1 %1600 }
 0x25c   :  { %v1619_v33 = vpop.permute.xlu0 %1618  ;;  %v1736_v36 = vrot.slane %v1728_v30, %v4256_v61  ;;  %v1743_v37 = vrot.slane %v1729_v31, %v4256_v61  ;;  %v1701_v53 = vsel %vm1698_vm2, %v1696_v48, %v1601_v32 }
 0x25d   :  { %v1706_v4 = vsel %vm1703_vm11, %v1701_v53, %v1619_v33 }
 0x25e   :  { %v1744_v47 = vcombine.high %v1736_v36, %v1736_v36  ;;  %v1745_v56 = vcombine.high %v1743_v37, %v1743_v37 }
 0x25f   :  { %v1665_v41 = vpop.permute.xlu1 %1664 }
 0x260   :  { %v1585_v49 = vpop.permute.xlu0 %1584  ;;  %v1714_v58 = vsel %vm1698_vm2, %v1710_v54, %v1665_v41  ;;  %v1780_v62 = vcombine.low %v1736_v36, %v1744_v47  ;;  %v1781_v3 = vcombine.low %v1743_v37, %v1745_v56  ;;  %v3329_v36 = vld [vmem:[%s4674_s5] ss:$0 sm:$0xff] }
 0x261   :  { %v1697_v16 = vsel %vm793_vm15, %v4174_v18, %v1585_v49  ;;  %v3330_v41 = vld [vmem:[%s4675_s6] ss:$0 sm:$0xff] }
 0x262   :  { %v1788_v10 = vrot.slane %v1780_v62, %v4256_v61  ;;  %v1795_v13 = vrot.slane %v1781_v3, %v4256_v61 }
 0x263   :  { %v1687_v59 = vpop.permute.xlu1 %1686 }
 0x264   :  { %v1718_v60 = vsel %vm1703_vm11, %v1714_v58, %v1687_v59  ;;  %v1603_v2 = vpop.permute.xlu0 %1602  ;;  %v1797_v22 = vcombine.high %v1788_v10, %v1795_v13  ;;  %v1796_v39 = vcombine.low %v1788_v10, %v1795_v13 }
 0x265   :  { %v1754_v46 = vcombine.low %v1706_v4, %v1718_v60  ;;  %v1755_v63 = vcombine.high %v1706_v4, %v1718_v60  ;;  %v1702_v52 = vsel %vm1698_vm2, %v1697_v16, %v1603_v2 }
 0x267   :  { %v1762_v9 = vrot.slane %v1754_v46, %v4256_v61  ;;  %v1649_v40 = vpop.permute.xlu1 %1648  ;;  %v1769_v26 = vrot.slane %v1755_v63, %v4256_v61 }
 0x268   :  { %v1621_v45 = vpop.permute.xlu0 %1620  ;;  %v1711_v20 = vsel %vm793_vm15, %v1630_v35, %v1649_v40 }
 0x269   :  { %v1770_v8 = vcombine.high %v1762_v9, %v1762_v9  ;;  %v1798_v1 = vcombine.low %v1753_v7, %v1762_v9  ;;  %v1707_v55 = vsel %vm1703_vm11, %v1702_v52, %v1621_v45  ;;  %v1771_v29 = vcombine.high %v1769_v26, %v1769_v26 }
 0x26b   :  { %v1667_v14 = vpop.permute.xlu1 %1666  ;;  %v1799_v15 = vcombine.low %v1770_v8, %v1769_v26  ;;  %v1806_v17 = vrot.slane %v1798_v1, %v4256_v61 }
 0x26c   :  { %v1715_v24 = vsel %vm1698_vm2, %v1711_v20, %v1667_v14 }
 0x26d   :  { %v1813_v19 = vrot.slane %v1799_v15, %v4256_v61 }
 0x26f   :  { %v1689_v25 = vpop.permute.xlu1 %1688  ;;  %v1815_v27 = vcombine.high %v1806_v17, %v1813_v19  ;;  %v1814_v28 = vcombine.low %v1806_v17, %v1813_v19 }
 0x270   :  { %v1719_v12 = vsel %vm1703_vm11, %v1715_v24, %v1689_v25  ;;  %vm4309_vm11 = vmor %vm2048_vm13, %vm1504_vm14 }
 0x271   :  { %v1772_v18 = vcombine.low %v1707_v55, %v1719_v12  ;;  %v1832_v11 = vpack.c.bf16 %v1815_v27, %v1797_v22  ;;  %v1831_v23 = vpack.c.bf16 %v1814_v28, %v1796_v39 }
 0x273   :  { %v1779_v30 = vrot.slane %v1772_v18, %v4256_v61  ;;  %1963 = vmatprep.mubr.bf16.mxu1 %v1832_v11 }
 0x274   :  { %1964 = vmatmul.mubr.bf16.vlgmr.msra.gmra.mrb[0].mxu1 %v1831_v23 }
 0x275   :  { %v1816_v31 = vcombine.low %v1771_v29, %v1779_v30 }
 0x277   :  { %v1823_v32 = vrot.slane %v1816_v31, %v4256_v61 }
 0x279   :  { %v1824_v33 = vcombine.high %v1823_v32, %v1823_v32  ;;  %v1833_v35 = vpack.c.bf16 %v1823_v32, %v1823_v32 }
 0x27b   :  { %v1834_v34 = vpack.c.bf16 %v1824_v33, %v1824_v33 }
 0x27d   :  { %1971 = vmatprep.mubr.bf16.mxu1 %v1834_v34 }
 0x27e   :  { %1972 = vmatmul.mubr.bf16.gmra.mrb[4].mxu1 %v1833_v35 }
 0x347   :  { %v3396_v51 = vpop.f32.mrb[0].mxu1 }
 0x348   :  { %v3397_v37 = vpop.f32.mrb[1].mxu1 }
 0x349   :  { %v3398_v6 = vadd.f32 %v3397_v37, %v3396_v51  ;;  %v3399_v38 = vpop.f32.mrb[2].mxu1 }
 0x34a   :  { %v3400_v42 = vpop.f32.mrb[3].mxu1 }
 0x34b   :  { %v1985_v44 = vmul.f32 %v3398_v6, %v3329_v36  ;;  %v3401_v48 = vadd.f32 %v3400_v42, %v3399_v38 }
 0x34d   :  { %v1994_v49 = vadd.f32 %v3330_v41, %v1985_v44  ;;  %v1986_v50 = vmul.f32 %v3401_v48, %v3329_v36 }
 0x34f   :  { %v1997_v21 = vmax.f32 %v1994_v49, 0.0  ;;  %v1995_v53 = vadd.f32 %v3330_v41, %v1986_v50 }
 0x351   :  { %v2003_v54 = vcombine.high %v1997_v21, %v1997_v21  ;;  %v4303_v47 = vrot.slane %v1997_v21, %v4256_v61  ;;  %v1998_v56 = vmax.f32 %v1995_v53, 0.0  ;;  %v3402_v4 = vpop.f32.mrb[4].mxu1  ;;  %v2159_v53 = vsub.s32 1, %v3873_v43  ;;  %v3522_v43 = vld [vmem:[%s4676_s7] sm:$0xff]  }
 0x352   :  { %v3403_v57 = vpop.f32.mrb[5].mxu1 }
 0x353   :  { %v2017_v58 = vrot.slane %v2003_v54, %v4256_v61  ;;  %v2018_v59 = vcombine.high %v4303_v47, %v4303_v47  ;;  %v2020_v60 = vcombine.high %v1998_v56, %v1998_v56  ;;  %v3405_v46 = vpop.f32.mrb[6].mxu1  ;;  %v3331_v2 = vrot.slane %v4303_v47, 9 }
 0x354   :  { %v4315_v62 = vrot.slane %v1998_v56, %v4256_v61  ;;  %v3404_v3 = vadd.f32 %v3403_v57, %v3402_v4  ;;  %v3406_v7 = vpop.f32.mrb[7].mxu1 }
 0x355   :  { %v2019_v9 = vcombine.high %v2017_v58, %v2017_v58  ;;  %v2052_v40 = vrot.slane %v2018_v59, 7  ;;  %v2055_v26 = vrot.slane %v2017_v58, 7  ;;  %v2034_v8 = vrot.slane %v2020_v60, %v4256_v61 }
 0x356   :  { %v4320_v1 = vcombine.high %v4315_v62, %v4315_v62  ;;  %v2061_v10 = vrot.slane %v4315_v62, 7  ;;  %v1987_v13 = vmul.f32 %v3404_v3, %v3329_v36 }
 0x357   :  { %v2053_v14 = vsel %vm4309_vm11, %v3331_v2, %v2052_v40  ;;  %v2054_v45 = vrot.slane %v2052_v40, 2  ;;  %v2057_v15 = vrot.slane %v2055_v26, 2  ;;  %v2058_v16 = vrot.slane %v2019_v9, 7 }
 0x358   :  { %v2085_v52 = vsel %vm2084_vm8, %v2053_v14, -inf  ;;  %v2036_v17 = vcombine.high %v2034_v8, %v2034_v8  ;;  %v3332_v19 = vrot.slane %v4320_v1, 9  ;;  %v2065_v20 = vrot.slane %v2034_v8, 7 }
 0x359   :  { %v2056_v55 = vsel %vm4309_vm11, %v2054_v45, %v2055_v26  ;;  %v2059_v22 = vsel %vm4309_vm11, %v2057_v15, %v2058_v16  ;;  %v2060_v24 = vrot.slane %v2058_v16, 2  ;;  %v2086_v25 = vrot.slane %v2085_v52, 4 }
 0x35a   :  { %v2092_v27 = vsel %vm2084_vm8, %v2056_v55, -inf  ;;  %v2099_v39 = vsel %vm2084_vm8, %v2059_v22, -inf  ;;  %v2066_v28 = vsel %vm4309_vm11, %v3332_v19, %v2065_v20  ;;  %v2067_v12 = vrot.slane %v2065_v20, 2 }
 0x35b   :  { %v2087_v18 = vmax.f32 %v2085_v52, %v2086_v25  ;;  %v2093_v11 = vrot.slane %v2092_v27, 4  ;;  %v2100_v23 = vrot.slane %v2099_v39, 4  ;;  %v2062_v29 = vsel %vm4309_vm11, %v2060_v24, %v2061_v10 }
 0x35c   :  { %v2068_v30 = vrot.slane %v2036_v17, 7  ;;  %v2106_v31 = vsel %vm2084_vm8, %v2062_v29, -inf  ;;  %v2113_v32 = vsel %vm2084_vm8, %v2066_v28, -inf  ;;  %v1996_v33 = vadd.f32 %v3330_v41, %v1987_v13 }
 0x35d   :  { %v2088_v34 = vrot.slane %v2087_v18, 2  ;;  %v2094_v35 = vmax.f32 %v2092_v27, %v2093_v11  ;;  %v2101_v51 = vmax.f32 %v2099_v39, %v2100_v23  ;;  %v2107_v36 = vrot.slane %v2106_v31, 4 }
 0x35e   :  { %v2069_v37 = vsel %vm4309_vm11, %v2067_v12, %v2068_v30  ;;  %v2114_v6 = vrot.slane %v2113_v32, 4  ;;  %v1999_v38 = vmax.f32 %v1996_v33, 0.0  ;;  %v2070_v58 = vrot.slane %v2068_v30, 2 }
 0x35f   :  { %v2089_v42 = vmax.f32 %v2087_v18, %v2088_v34  ;;  %v2095_v44 = vrot.slane %v2094_v35, 2  ;;  %v2102_v48 = vrot.slane %v2101_v51, 2  ;;  %v2108_v49 = vmax.f32 %v2106_v31, %v2107_v36 }
 0x360   :  { %v2115_v50 = vmax.f32 %v2113_v32, %v2114_v6  ;;  %v2120_v21 = vsel %vm2084_vm8, %v2069_v37, -inf  ;;  %v2043_v41 = vrot.slane %v1999_v38, %v4256_v61  ;;  %v2160_v39 = vrot.slane %v4315_v62, %v2159_v53 }
 0x361   :  { %v2090_v54 = vrot.slane %v2089_v42, 1  ;;  %v2096_v56 = vmax.f32 %v2094_v35, %v2095_v44  ;;  %v2103_v4 = vmax.f32 %v2101_v51, %v2102_v48  ;;  %v2109_v57 = vrot.slane %v2108_v49, 2 }
 0x362   :  { %v2121_v59 = vrot.slane %v2120_v21, 4  ;;  %v2044_v60 = vcombine.high %v2043_v41, %v2043_v41  ;;  %v2071_v46 = vrot.slane %v2043_v41, 7  ;;  %v2116_v9 = vrot.slane %v2115_v50, 2 }
 0x363   :  { %v2097_v2 = vrot.slane %v2096_v56, 1  ;;  %v2104_v3 = vrot.slane %v2103_v4, 1  ;;  %v2110_v7 = vmax.f32 %v2108_v49, %v2109_v57  ;;  %v2091_v40 = vmax.f32 %v2089_v42, %v2090_v54 }
 0x364   :  { %v2122_v26 = vmax.f32 %v2120_v21, %v2121_v59  ;;  %v2072_v8 = vsel %vm4309_vm11, %v2070_v58, %v2071_v46  ;;  %v2073_v10 = vrot.slane %v2071_v46, 2  ;;  %v2074_v45 = vrot.slane %v2044_v60, 7  ;;  %v3520_v59 = vld [vmem:[%s4676_s7 + $0x40] sm:$0xff]  }
 0x365   :  { %v2098_v13 = vmax.f32 %v2096_v56, %v2097_v2  ;;  %v2105_v61 = vmax.f32 %v2103_v4, %v2104_v3  ;;  %v2111_v14 = vrot.slane %v2110_v7, 1  ;;  %v2127_v16 = vsel %vm2084_vm8, %v2072_v8, -inf  ;;  %v3521_v46 = vld [vmem:[%s4676_s7 + $0xc0] sm:$0xff]   ;;  %3408 = vmatprep.subr.bf16.mxu0 %v3520_v59  ;;  %v3526_v8 = vld [vmem:[%s4676_s7 + $0x8] sm:$0xff]  }
 0x366   :  { %v2123_v15 = vrot.slane %v2122_v26, 2  ;;  %v2075_v19 = vsel %vm4309_vm11, %v2073_v10, %v2074_v45  ;;  %v2128_v20 = vrot.slane %v2127_v16, 4  ;;  %v2117_v55 = vmax.f32 %v2115_v50, %v2116_v9  ;;  %v3523_v3 = vld [vmem:[%s4676_s7 + $0x80] sm:$0xff]   ;;  %3430 = vmatprep.subr.bf16.mxu1 %v3521_v46  ;;  %3409 = vmatpush3.bf16.msra.mxu0 %v3522_v43 }
 0x367   :  { %v2112_v52 = vmax.f32 %v2110_v7, %v2111_v14  ;;  %v2149_v17 = vsel %vm1496_vm9, %v2098_v13, %v2091_v40  ;;  %v2134_v25 = vsel %vm2084_vm8, %v2075_v19, -inf  ;;  %v2164_v4 = vrot.slane %v2044_v60, %v2159_v53  ;;  %v3524_v40 = vld [vmem:[%s4676_s7 + $0x48] sm:$0xff]   ;;  %3431 = vmatpush3.bf16.msra.mxu1 %v3523_v3 }
 0x368   :  { %v2124_v22 = vmax.f32 %v2122_v26, %v2123_v15  ;;  %v2150_v24 = vsel %vm1498_vm10, %v2105_v61, %v2149_v17  ;;  %v2129_v28 = vmax.f32 %v2127_v16, %v2128_v20  ;;  %v2135_v12 = vrot.slane %v2134_v25, 4  ;;  %v3525_v26 = vld [vmem:[%s4676_s7 + $0xc8] sm:$0xff]   ;;  %3410 = vmatprep.subr.bf16.mxu0 %v3524_v40 }
 0x369   :  { %v2151_v27 = vsel %vm1500_vm12, %v2112_v52, %v2150_v24  ;;  %v2118_v30 = vrot.slane %v2117_v55, 1  ;;  %v3527_v13 = vld [vmem:[%s4676_s7 + $0x88] sm:$0xff]   ;;  %3432 = vmatprep.subr.bf16.mxu1 %v3525_v26  ;;  %v3530_v24 = vld [vmem:[%s4676_s7 + $0x10] sm:$0xff]  }
 0x36a   :  { %v2125_v18 = vrot.slane %v2124_v22, 1  ;;  %v2167_v63 = vsel %vm254_vm6, %v4303_v47, %v2151_v27  ;;  %v2130_v23 = vrot.slane %v2129_v28, 2  ;;  %v2136_v29 = vmax.f32 %v2134_v25, %v2135_v12  ;;  %3411 = vmatpush3.bf16.msra.mxu0 %v3526_v8  ;;  %v3531_v27 = vld [vmem:[%s4676_s7 + $0x90] sm:$0xff]   ;;  %v3534_v12 = vld [vmem:[%s4676_s7 + $0x18] sm:$0xff]  }
 0x36b   :  { %v2169_v11 = vsel %vm139_vm3, %v2167_v63, %v2160_v39  ;;  %v2119_v47 = vmax.f32 %v2117_v55, %v2118_v30  ;;  %3433 = vmatpush3.bf16.msra.mxu1 %v3527_v13  ;;  %v3528_v55 = vld [vmem:[%s4676_s7 + $0x50] sm:$0xff]   ;;  %v3532_v39 = vld [vmem:[%s4676_s7 + $0x58] sm:$0xff]   ;;  %v3536_v63 = vld [vmem:[%s4676_s7 + $0x60] sm:$0xff]  }
 0x36c   :  { %v2239_v31 = vrot.slane %v2169_v11, 4  ;;  %v2131_v32 = vmax.f32 %v2129_v28, %v2130_v23  ;;  %v2137_v33 = vrot.slane %v2136_v29, 2  ;;  %v2126_v34 = vmax.f32 %v2124_v22, %v2125_v18  ;;  %v3529_v22 = vld [vmem:[%s4676_s7 + $0xd0] sm:$0xff]   ;;  %v3533_v28 = vld [vmem:[%s4676_s7 + $0xd8] sm:$0xff]   ;;  %3412 = vmatprep.subr.bf16.mxu0 %v3528_v55  ;;  %v3537_v11 = vld [vmem:[%s4676_s7 + $0xe0] sm:$0xff]  }
 0x36d   :  { %3434 = vmatprep.subr.bf16.mxu1 %v3529_v22  ;;  %v3535_v18 = vld [vmem:[%s4676_s7 + $0x98] sm:$0xff]   ;;  %v3538_v23 = vld [vmem:[%s4676_s7 + $0x20] sm:$0xff]   ;;  %v3540_v30 = vld [vmem:[%s4676_s7 + $0x68] sm:$0xff]  }
 0x36e   :  { %v4360_v35 = vsel %vm60_vm0, 0.0, %v2239_v31  ;;  %v4363_v62 = vsel %vm225_vm5, %v2239_v31, 0.0  ;;  %v2132_v51 = vrot.slane %v2131_v32, 1  ;;  %v2138_v36 = vmax.f32 %v2136_v29, %v2137_v33  ;;  %3413 = vmatpush3.bf16.msra.mxu0 %v3530_v24  ;;  %v3539_v29 = vld [vmem:[%s4676_s7 + $0xa0] sm:$0xff]   ;;  %v3541_v31 = vld [vmem:[%s4676_s7 + $0xe8] sm:$0xff]  }
 0x36f   :  { %v2249_v37 = vrot.slane %v4360_v35, 1  ;;  %v2267_v6 = vrot.slane %v4360_v35, 3  ;;  %v2268_v38 = vrot.slane %v4363_v62, 3  ;;  %v2152_v48 = vsel %vm1496_vm9, %v2126_v34, %v2119_v47  ;;  %3435 = vmatpush3.bf16.msra.mxu1 %v3531_v27  ;;  %3414 = vmatprep.subr.bf16.mxu0 %v3532_v39  ;;  %v3543_v33 = vld [vmem:[%s4676_s7 + $0xa8] sm:$0xff]   ;;  %v3544_v34 = vld [vmem:[%s4676_s7 + $0x70] sm:$0xff]   ;;  %v3548_v47 = vld [vmem:[%s4676_s7 + $0x78] sm:$0xff]  }
 0x370   :  { %v2133_v42 = vmax.f32 %v2131_v32, %v2132_v51  ;;  %v2139_v44 = vrot.slane %v2138_v36, 1  ;;  %v2287_v41 = vrot.slane %v4360_v35, 5  ;;  %v2288_v54 = vrot.slane %v4363_v62, 5  ;;  %3436 = vmatprep.subr.bf16.mxu1 %v3533_v28  ;;  %v3542_v32 = vld [vmem:[%s4676_s7 + $0x28] sm:$0xff]   ;;  %v3545_v51 = vld [vmem:[%s4676_s7 + $0xf0] sm:$0xff]  }
 0x371   :  { %2251 = vrot.lane.b32.xlu0 %v2249_v37, %s3615_s3  ;;  %v2269_v21 = vsel %vm139_vm3, %v2267_v6, %v2268_v38  ;;  %v2307_v2 = vrot.slane %v4360_v35, 7  ;;  %v3547_v37 = vld [vmem:[%s4676_s7 + $0xb0] sm:$0xff]   ;;  %v3549_v6 = vld [vmem:[%s4676_s7 + $0xf8] sm:$0xff]  }
 0x372   :  { %v2140_v49 = vmax.f32 %v2138_v36, %v2139_v44  ;;  %v2153_v50 = vsel %vm1498_vm10, %v2133_v42, %v2152_v48  ;;  %v2289_v60 = vsel %vm196_vm4, %v2287_v41, %v2288_v54  ;;  %3415 = vmatpush3.bf16.msra.mxu0 %v3534_v12  ;;  %v3546_v36 = vld [vmem:[%s4676_s7 + $0x30] sm:$0xff]   ;;  %v3550_v38 = vld [vmem:[%s4676_s7 + $0x38] sm:$0xff]   ;;  %v2280_v41 = vrot.slane %v4363_v62, 4 }
 0x373   :  { %3437 = vmatpush3.bf16.msra.mxu1 %v3535_v18  ;;  %3416 = vmatprep.subr.bf16.mxu0 %v3536_v63  ;;  %v3551_v42 = vld [vmem:[%s4676_s7 + $0xb8] sm:$0xff]  }
 0x374   :  { %v2154_v56 = vsel %vm1500_vm12, %v2140_v49, %v2153_v50  ;;  %3438 = vmatprep.subr.bf16.mxu1 %v3537_v11  ;;  %v2259_v49 = vrot.slane %v4360_v35, 2  ;;  %v2260_v50 = vrot.slane %v4363_v62, 2 }
 0x375   :  { %2273 = vrot.lane.b32.xlu0 %v2269_v21, %s3615_s3  ;;  %v2168_v57 = vsel %vm254_vm6, %v4320_v1, %v2154_v56  ;;  %v2308_v1 = vrot.slane %v4363_v62, 7  ;;  %v2279_v21 = vrot.slane %v4360_v35, 4  ;;  %v2299_v56 = vrot.slane %v4360_v35, 6 }
 0x376   :  { %v2170_v58 = vsel %vm139_vm3, %v2168_v57, %v2164_v4  ;;  %3417 = vmatpush3.bf16.msra.mxu0 %v3538_v23  ;;  %v2300_v4 = vrot.slane %v4363_v62, 6  ;;  %v2261_v57 = vsel %vm110_vm1, %v2259_v49, %v2260_v50 }
 0x377   :  { %v2240_v53 = vrot.slane %v2170_v58, 4  ;;  %v2309_v45 = vsel %vm254_vm6, %v2307_v2, %v2308_v1  ;;  %3439 = vmatpush3.bf16.msra.mxu1 %v3539_v29  ;;  %3418 = vmatprep.subr.bf16.mxu0 %v3540_v30  ;;  %v2281_v43 = vsel %vm60_vm0, %v2279_v21, %v2280_v41 }
 0x378   :  { %3440 = vmatprep.subr.bf16.mxu1 %v3541_v31 }
 0x379   :  { %2293 = vrot.lane.b32.xlu0 %v2289_v60, %s3615_s3  ;;  %v4398_v7 = vsel %vm60_vm0, 0.0, %v2240_v53  ;;  %v4401_v9 = vsel %vm225_vm5, %v2240_v53, 0.0  ;;  %v2301_v53 = vsel %vm225_vm5, %v2299_v56, %v2300_v4 }
 0x37a   :  { %v2250_v10 = vrot.slane %v4398_v7, 1  ;;  %v2270_v61 = vrot.slane %v4398_v7, 3  ;;  %v2271_v14 = vrot.slane %v4401_v9, 3  ;;  %v2290_v16 = vrot.slane %v4398_v7, 5  ;;  %3419 = vmatpush3.bf16.msra.mxu0 %v3542_v32 }
 0x37b   :  { %v2291_v52 = vrot.slane %v4401_v9, 5  ;;  %v2310_v19 = vrot.slane %v4398_v7, 7  ;;  %v2311_v20 = vrot.slane %v4401_v9, 7  ;;  %3441 = vmatpush3.bf16.msra.mxu1 %v3543_v33  ;;  %3420 = vmatprep.subr.bf16.mxu0 %v3544_v34  ;;  %v2262_v26 = vrot.slane %v4398_v7, 2 }
 0x37c   :  { %2253 = vrot.lane.b32.xlu1 %v2250_v10, %s3615_s3  ;;  %v2272_v15 = vsel %vm139_vm3, %v2270_v61, %v2271_v14  ;;  %3442 = vmatprep.subr.bf16.mxu1 %v3545_v51  ;;  %v2263_v8 = vrot.slane %v4401_v9, 2  ;;  %v2303_v55 = vrot.slane %v4401_v9, 6  ;;  %vm3159_vm3 = vcmask 1041409  }
 0x37d   :  { %2313 = vrot.lane.b32.xlu0 %v2309_v45, %s3615_s3  ;;  %v2292_v17 = vsel %vm196_vm4, %v2290_v16, %v2291_v52  ;;  %v2312_v25 = vsel %vm254_vm6, %v2310_v19, %v2311_v20  ;;  %v2282_v16 = vrot.slane %v4398_v7, 4  ;;  %v2302_v20 = vrot.slane %v4398_v7, 6 }
 0x37e   :  { %3421 = vmatpush3.bf16.msra.mxu0 %v3546_v36  ;;  %v2264_v52 = vsel %vm110_vm1, %v2262_v26, %v2263_v8  ;;  %vm3153_vm1 = vcmask 125952   ;;  %vm4686_vm4 = vcmask 130048  }
 0x37f   :  { %3443 = vmatpush3.bf16.msra.mxu1 %v3547_v37  ;;  %3422 = vmatprep.subr.bf16.mxu0 %v3548_v47  ;;  %v2304_v23 = vsel %vm225_vm5, %v2302_v20, %v2303_v55  ;;  %vm3181_vm5 = vcmask 392192  }
 0x380   :  { %2275 = vrot.lane.b32.xlu1 %v2272_v15, %s3615_s3  ;;  %3444 = vmatprep.subr.bf16.mxu1 %v3549_v6 }
 0x382   :  { %3423 = vmatpush3.bf16.msra.mxu0 %v3550_v38 }
 0x383   :  { %3445 = vmatpush3.bf16.msra.mxu1 %v3551_v42  ;;  %3473 = vmatprep.subr.bf16.mxu0 %v3611_v0 }
 0x384   :  { %2295 = vrot.lane.b32.xlu1 %v2292_v17, %s3615_s3  ;;  %v2283_v17 = vrot.slane %v4401_v9, 4 }
 0x386   :  { %v2284_v11 = vsel %vm60_vm0, %v2282_v16, %v2283_v17  ;;  %vm3096_vm0 = vcmask 123904  }
 0x388   :  { %2315 = vrot.lane.b32.xlu1 %v2312_v25, %s3615_s3 }
 0x3e3   :  { %v2252_v44 = vpop.permute.xlu0 %2251 }
 0x3e4   :  { %v2319_v59 = vsel %vm1698_vm2, %v4360_v35, %v2252_v44 }
 0x3e7   :  { %v2274_v48 = vpop.permute.xlu0 %2273 }
 0x3e8   :  { %v2321_v58 = vsel %vm1698_vm2, %v2261_v57, %v2274_v48 }
 0x3e9   :  { %v2335_v2 = vcombine.low %v2319_v59, %v2321_v58  ;;  %v2336_v13 = vcombine.high %v2319_v59, %v2321_v58 }
 0x3eb   :  { %v2294_v54 = vpop.permute.xlu0 %2293  ;;  %v2345_v61 = vrot.slane %v2335_v2, %v3881_v5  ;;  %v2352_v22 = vrot.slane %v2336_v13, %v3881_v5 }
 0x3ec   :  { %v2323_v1 = vsel %vm1698_vm2, %v2281_v43, %v2294_v54 }
 0x3ee   :  { %v2254_v46 = vpop.permute.xlu1 %2253 }
 0x3ef   :  { %v2314_v60 = vpop.permute.xlu0 %2313  ;;  %v2320_v25 = vsel %vm1698_vm2, %v4398_v7, %v2254_v46 }
 0x3f0   :  { %v2325_v3 = vsel %vm1698_vm2, %v2301_v53, %v2314_v60 }
 0x3f1   :  { %v2337_v40 = vcombine.low %v2323_v1, %v2325_v3  ;;  %v2338_v62 = vcombine.high %v2323_v1, %v2325_v3 }
 0x3f2   :  { %v2276_v10 = vpop.permute.xlu1 %2275 }
 0x3f3   :  { %v2359_v35 = vrot.slane %v2337_v40, %v3881_v5  ;;  %v2366_v14 = vrot.slane %v2338_v62, %v3881_v5  ;;  %v2322_v24 = vsel %vm1698_vm2, %v2264_v52, %v2276_v10 }
 0x3f4   :  { %v2402_v18 = vcombine.low %v2320_v25, %v2322_v24  ;;  %v2403_v63 = vcombine.high %v2320_v25, %v2322_v24 }
 0x3f5   :  { %v2367_v45 = vcombine.low %v2345_v61, %v2359_v35  ;;  %v2368_v15 = vcombine.high %v2345_v61, %v2359_v35  ;;  %v2369_v27 = vcombine.low %v2352_v22, %v2366_v14  ;;  %v2370_v39 = vcombine.high %v2352_v22, %v2366_v14 }
 0x3f6   :  { %v2296_v19 = vpop.permute.xlu1 %2295  ;;  %v2412_v36 = vrot.slane %v2402_v18, %v3881_v5  ;;  %v2419_v37 = vrot.slane %v2403_v63, %v3881_v5 }
 0x3f7   :  { %v2377_v28 = vrot.slane %v2367_v45, %v3881_v5  ;;  %v2391_v12 = vrot.slane %v2368_v15, %v3881_v5  ;;  %v2324_v29 = vsel %vm1698_vm2, %v2284_v11, %v2296_v19  ;;  %v2384_v7 = vrot.slane %v2369_v27, %v3881_v5 }
 0x3f8   :  { %v2398_v33 = vrot.slane %v2370_v39, %v3881_v5 }
 0x3f9   :  { %v2469_v34 = vcombine.low %v2377_v28, %v2391_v12  ;;  %v3333_v51 = vcombine.high %v2377_v28, %v2391_v12  ;;  %v2400_v41 = vcombine.high %v2384_v7, %v2384_v7 }
 0x3fa   :  { %v2316_v9 = vpop.permute.xlu1 %2315  ;;  %v2471_v49 = vcombine.low %v2384_v7, %v2398_v33 }
 0x3fb   :  { %v2326_v30 = vsel %vm1698_vm2, %v2304_v23, %v2316_v9  ;;  %v2479_v50 = vrot.slane %v2469_v34, %v3881_v5  ;;  %v2486_v21 = vrot.slane %v3333_v51, %v3881_v5 }
 0x3fc   :  { %v2404_v31 = vcombine.low %v2324_v29, %v2326_v30  ;;  %v2405_v32 = vcombine.high %v2324_v29, %v2326_v30  ;;  %v2493_v53 = vrot.slane %v2471_v49, %v3881_v5  ;;  %v3552_v30 = vld [vmem:[%s4679_s10] sm:$0xff]  }
 0x3fd   :  { %v2501_v60 = vcombine.low %v2479_v50, %v2486_v21  ;;  %v2502_v2 = vcombine.high %v2479_v50, %v2486_v21  ;;  %v3367_v50 = vld [vmem:[%s4678_s9] ss:$0 sm:$0xff] }
 0x3fe   :  { %v2426_v47 = vrot.slane %v2404_v31, %v3881_v5  ;;  %v2433_v6 = vrot.slane %v2405_v32, %v3881_v5  ;;  %v3553_v31 = vld [vmem:[%s4679_s10 + $0x8] sm:$0xff]  }
 0x3ff   :  { %v2518_v13 = vrot.slane %v2502_v2, %v3881_v5  ;;  %v2511_v14 = vrot.slane %v2501_v60, %v3881_v5 }
 0x400   :  { %v2434_v38 = vcombine.low %v2412_v36, %v2426_v47  ;;  %v2435_v42 = vcombine.high %v2412_v36, %v2426_v47  ;;  %v2436_v44 = vcombine.low %v2419_v37, %v2433_v6  ;;  %v2437_v48 = vcombine.high %v2419_v37, %v2433_v6  ;;  %v3366_v6 = vld [vmem:[%s4677_s8] ss:$0 sm:$0xff] }
 0x402   :  { %v2444_v54 = vrot.slane %v2434_v38, %v3881_v5  ;;  %v2451_v56 = vrot.slane %v2436_v44, %v3881_v5  ;;  %v2458_v4 = vrot.slane %v2435_v42, %v3881_v5  ;;  %v2465_v57 = vrot.slane %v2437_v48, %v3881_v5 }
 0x404   :  { %v2466_v58 = vcombine.high %v2444_v54, %v2444_v54  ;;  %v2467_v59 = vcombine.high %v2451_v56, %v2451_v56  ;;  %v2468_v46 = vcombine.high %v2458_v4, %v2458_v4  ;;  %v2472_v43 = vcombine.low %v2400_v41, %v2444_v54 }
 0x406   :  { %v2537_v1 = vcombine.low %v2458_v4, %v2466_v58  ;;  %v2538_v3 = vcombine.low %v2468_v46, %v2451_v56  ;;  %v2539_v40 = vcombine.low %v2465_v57, %v2467_v59  ;;  %v2500_v62 = vrot.slane %v2472_v43, %v3881_v5 }
 0x408   :  { %v2503_v26 = vcombine.low %v2493_v53, %v2500_v62  ;;  %v2504_v8 = vcombine.high %v2493_v53, %v2500_v62  ;;  %v2546_v10 = vrot.slane %v2537_v1, %v3881_v5  ;;  %v2553_v35 = vrot.slane %v2538_v3, %v3881_v5 }
 0x409   :  { %v2560_v61 = vrot.slane %v2539_v40, %v3881_v5 }
 0x40a   :  { %v2532_v45 = vrot.slane %v2504_v8, %v3881_v5  ;;  %v2561_v15 = vcombine.low %v2546_v10, %v2553_v35  ;;  %v2562_v16 = vcombine.high %v2546_v10, %v2553_v35  ;;  %v2525_v52 = vrot.slane %v2503_v26, %v3881_v5 }
 0x40b   :  { %v2563_v17 = vcombine.high %v2560_v61, %v2560_v61  ;;  %v2584_v24 = vrot.slane %v2560_v61, %v3881_v5 }
 0x40c   :  { %v2535_v19 = vcombine.low %v2518_v13, %v2532_v45  ;;  %v2577_v20 = vrot.slane %v2562_v16, %v3881_v5  ;;  %v2536_v55 = vcombine.high %v2518_v13, %v2532_v45  ;;  %v2533_v22 = vcombine.low %v2511_v14, %v2525_v52 }
 0x40d   :  { %v2591_v25 = vrot.slane %v2563_v17, %v3881_v5  ;;  %v2570_v27 = vrot.slane %v2561_v15, %v3881_v5  ;;  %v2534_v39 = vcombine.high %v2511_v14, %v2525_v52 }
 0x40f   :  { %v2594_v28 = vcombine.low %v2577_v20, %v2591_v25  ;;  %v2595_v12 = vcombine.high %v2577_v20, %v2591_v25  ;;  %v2592_v18 = vcombine.low %v2570_v27, %v2584_v24  ;;  %v2593_v63 = vcombine.high %v2570_v27, %v2584_v24 }
 0x411   :  { %v2605_v11 = vpack.c.bf16 %v2594_v28, %v2535_v19  ;;  %v2607_v23 = vpack.c.bf16 %v2595_v12, %v2536_v55  ;;  %v2604_v9 = vpack.c.bf16 %v2592_v18, %v2533_v22  ;;  %v2606_v29 = vpack.c.bf16 %v2593_v63, %v2534_v39 }
 0x413   :  { %2832 = vmatprep.mubr.bf16.mxu0 %v2605_v11  ;;  %2873 = vmatprep.mubr.bf16.mxu1 %v2607_v23 }
 0x414   :  { %2833 = vmatmul.mubr.bf16.vlgmr.msra.gmra.mrb[12].mxu0 %v2604_v9  ;;  %2874 = vmatmul.mubr.bf16.vlgmr.msra.gmra.mrb[8].mxu1 %v2606_v29 }
 0x415   :  { %3481 = vmatprep.mubr.msk.bf16.mxu0 %vm3612_vm7, %v3611_v0  ;;  %3474 = vmatpush3.bf16.msra.mxu0 %v3552_v30 }
 0x416   :  { %3475 = vmatprep.subr.bf16.mxu0 %v3611_v0 }
 0x419   :  { %3476 = vmatpush3.bf16.msra.mxu0 %v3553_v31 }
 0x41a   :  { %3477 = vmatprep.subr.bf16.mxu0 %v3611_v0 }
 0x4e7   :  { %v3424_v32 = vpop.f32.mrb[12].mxu0  ;;  %v3446_v7 = vpop.f32.mrb[8].mxu1 }
 0x4e8   :  { %v3425_v33 = vpop.f32.mrb[13].mxu0  ;;  %v3447_v34 = vpop.f32.mrb[9].mxu1 }
 0x4e9   :  { %v3426_v51 = vadd.f32 %v3425_v33, %v3424_v32  ;;  %v3448_v36 = vadd.f32 %v3447_v34, %v3446_v7  ;;  %v3427_v37 = vpop.f32.mrb[14].mxu0  ;;  %v3449_v47 = vpop.f32.mrb[10].mxu1 }
 0x4ea   :  { %v3428_v38 = vpop.f32.mrb[15].mxu0  ;;  %v3450_v42 = vpop.f32.mrb[11].mxu1 }
 0x4eb   :  { %v2876_v44 = vadd.f32 %v3448_v36, %v3426_v51  ;;  %v3429_v48 = vadd.f32 %v3428_v38, %v3427_v37  ;;  %v3451_v49 = vadd.f32 %v3450_v42, %v3449_v47 }
 0x4ed   :  { %v2888_v21 = vmul.f32 %v3366_v6, %v2876_v44  ;;  %v2879_v41 = vadd.f32 %v3451_v49, %v3429_v48 }
 0x4ef   :  { %v2896_v54 = vadd.f32 %v3367_v50, %v2888_v21  ;;  %v2889_v56 = vmul.f32 %v3366_v6, %v2879_v41 }
 0x4f1   :  { %v2898_v4 = vmax.f32 %v2896_v54, 0.0  ;;  %v2897_v57 = vadd.f32 %v3367_v50, %v2889_v56 }
 0x4f3   :  { %v2902_v58 = vcombine.high %v2898_v4, %v2898_v4  ;;  %v2909_v59 = vrot.slane %v2898_v4, %v3881_v5  ;;  %v2899_v46 = vmax.f32 %v2897_v57, 0.0 }
 0x4f5   :  { %v2916_v43 = vrot.slane %v2902_v58, %v3881_v5  ;;  %v2917_v53 = vcombine.high %v2909_v59, %v2909_v59  ;;  %v4582_v60 = vrot.slane %v2909_v59, %v3881_v5  ;;  %v2951_v2 = vcombine.high %v2899_v46, %v2899_v46  ;;  %v3554_v58 = vld [vmem:[%s4679_s10 + $0x10] sm:$0xff]  }
 0x4f6   :  { %v2958_v1 = vrot.slane %v2899_v46, %v3881_v5  ;;  %3478 = vmatpush3.bf16.msra.mxu0 %v3554_v58 }
 0x4f7   :  { %v2918_v3 = vcombine.high %v2916_v43, %v2916_v43  ;;  %v2932_v40 = vrot.slane %v2916_v43, %v3881_v5  ;;  %v2939_v62 = vrot.slane %v2917_v53, %v3881_v5  ;;  %v2947_v26 = vcombine.high %v4582_v60, %v4582_v60  ;;  %3479 = vmatprep.subr.bf16.mxu0 %v3611_v0 }
 0x4f8   :  { %v2965_v8 = vrot.slane %v2951_v2, %v3881_v5  ;;  %v2966_v10 = vcombine.high %v2958_v1, %v2958_v1  ;;  %v2974_v15 = vrot.slane %v2958_v1, %v3881_v5 }
 0x4f9   :  { %v2948_v35 = vcombine.high %v2932_v40, %v2932_v40  ;;  %v2949_v13 = vcombine.high %v2939_v62, %v2939_v62  ;;  %v3000_v61 = vcombine.low %v2939_v62, %v2947_v26  ;;  %v4591_v14 = vrot.slane %v2918_v3, %v3881_v5 }
 0x4fa   :  { %v2967_v45 = vcombine.high %v2965_v8, %v2965_v8  ;;  %v2988_v16 = vrot.slane %v2966_v10, %v3881_v5  ;;  %v2981_v20 = vrot.slane %v2965_v8, %v3881_v5 }
 0x4fb   :  { %v3007_v52 = vrot.slane %v3000_v61, %v3881_v5  ;;  %v3015_v17 = vcombine.low %v2949_v13, %v2932_v40  ;;  %v3030_v19 = vcombine.low %v4591_v14, %v2948_v35  ;;  %v3555_v61 = vld [vmem:[%s4679_s10 + $0x18] sm:$0xff]   ;;  %s3618_s10 = smov 48  }
 0x4fc   :  { %v2995_v55 = vrot.slane %v2967_v45, %v3881_v5  ;;  %v3045_v22 = vcombine.low %v2974_v15, %v2988_v16  ;;  %v3368_v24 = vcombine.high %v2974_v15, %v2988_v16  ;;  %3480 = vmatpush3.bf16.msra.mxu0 %v3555_v61 }
 0x4fd   :  { %v3014_v25 = vrot.slane %v3007_v52, %v3881_v5  ;;  %v3022_v27 = vrot.slane %v3015_v17, %v3881_v5  ;;  %v3037_v39 = vrot.slane %v3030_v19, %v3881_v5 }
 0x4fe   :  { %v3052_v28 = vrot.slane %v3045_v22, %v3881_v5  ;;  %v3067_v12 = vrot.slane %v3368_v24, %v3881_v5  ;;  %v3075_v18 = vcombine.low %v2981_v20, %v2995_v55  ;;  %v2950_v20 = vcombine.high %v4591_v14, %v4591_v14 }
 0x4ff   :  { %v3029_v63 = vrot.slane %v3022_v27, %v3881_v5  ;;  %v3097_v11 = vsel %vm3096_vm0, %v3014_v25, -inf  ;;  %v3044_v23 = vrot.slane %v3037_v39, %v3881_v5 }
 0x500   :  { %v3098_v9 = vrot.slane %v3097_v11, 4  ;;  %v3059_v29 = vrot.slane %v3052_v28, %v3881_v5  ;;  %v3074_v30 = vrot.slane %v3067_v12, %v3881_v5  ;;  %v3082_v31 = vrot.slane %v3075_v18, %v3881_v5 }
 0x501   :  { %v3104_v32 = vsel %vm3096_vm0, %v3029_v63, -inf  ;;  %v3111_v7 = vsel %vm3096_vm0, %v3044_v23, -inf }
 0x502   :  { %v3099_v33 = vmax.f32 %v3097_v11, %v3098_v9  ;;  %v3105_v34 = vrot.slane %v3104_v32, 4  ;;  %v3089_v51 = vrot.slane %v3082_v31, %v3881_v5  ;;  %v3118_v36 = vsel %vm3096_vm0, %v3059_v29, -inf }
 0x503   :  { %v3119_v37 = vrot.slane %v3118_v36, 4  ;;  %v3125_v47 = vsel %vm3096_vm0, %v3074_v30, -inf  ;;  %v3112_v6 = vrot.slane %v3111_v7, 4 }
 0x504   :  { %v3100_v38 = vrot.slane %v3099_v33, 2  ;;  %v3106_v42 = vmax.f32 %v3104_v32, %v3105_v34  ;;  %v3126_v44 = vrot.slane %v3125_v47, 4  ;;  %v3132_v48 = vsel %vm3096_vm0, %v3089_v51, -inf }
 0x505   :  { %v3120_v49 = vmax.f32 %v3118_v36, %v3119_v37  ;;  %v3113_v50 = vmax.f32 %v3111_v7, %v3112_v6  ;;  %v3133_v21 = vrot.slane %v3132_v48, 4 }
 0x506   :  { %v3107_v41 = vrot.slane %v3106_v42, 2  ;;  %v3127_v54 = vmax.f32 %v3125_v47, %v3126_v44  ;;  %v3101_v56 = vmax.f32 %v3099_v33, %v3100_v38 }
 0x507   :  { %v3114_v4 = vrot.slane %v3113_v50, 2  ;;  %v3121_v57 = vrot.slane %v3120_v49, 2  ;;  %v3134_v5 = vmax.f32 %v3132_v48, %v3133_v21 }
 0x508   :  { %v3102_v59 = vrot.slane %v3101_v56, 1  ;;  %v3108_v46 = vmax.f32 %v3106_v42, %v3107_v41  ;;  %v3128_v43 = vrot.slane %v3127_v54, 2 }
 0x509   :  { %v3115_v53 = vmax.f32 %v3113_v50, %v3114_v4  ;;  %v3122_v2 = vmax.f32 %v3120_v49, %v3121_v57  ;;  %v3135_v1 = vrot.slane %v3134_v5, 2 }
 0x50a   :  { %v3109_v3 = vrot.slane %v3108_v46, 1  ;;  %v3129_v40 = vmax.f32 %v3127_v54, %v3128_v43  ;;  %v3103_v10 = vmax.f32 %v3101_v56, %v3102_v59 }
 0x50b   :  { %v3116_v62 = vrot.slane %v3115_v53, 1  ;;  %v3123_v26 = vrot.slane %v3122_v2, 1  ;;  %v3136_v8 = vmax.f32 %v3134_v5, %v3135_v1 }
 0x50c   :  { %v3110_v35 = vmax.f32 %v3108_v46, %v3109_v3  ;;  %v3130_v13 = vrot.slane %v3129_v40, 1 }
 0x50d   :  { %v3117_v45 = vmax.f32 %v3115_v53, %v3116_v62  ;;  %v3124_v15 = vmax.f32 %v3122_v2, %v3123_v26  ;;  %v3137_v16 = vrot.slane %v3136_v8, 1 }
 0x50e   :  { %v3131_v52 = vmax.f32 %v3129_v40, %v3130_v13  ;;  %v3145_v17 = vsel %vm1496_vm9, %v3110_v35, %v3103_v10 }
 0x50f   :  { %v3138_v19 = vmax.f32 %v3136_v8, %v3137_v16  ;;  %v3146_v0 = vsel %vm1498_vm10, %v3117_v45, %v3145_v17 }
 0x510   :  { %v3147_v55 = vsel %vm1496_vm9, %v3131_v52, %v3124_v15  ;;  %v3151_v22 = vsel %vm254_vm6, %v4582_v60, %v3146_v0 }
 0x511   :  { %v3148_v24 = vsel %vm1498_vm10, %v3138_v19, %v3147_v55  ;;  %v3162_v25 = vrot.slane %v3151_v22, 1  ;;  %v3167_v27 = vrot.slane %v3151_v22, 2  ;;  %v3173_v39 = vrot.slane %v3151_v22, 3  ;;  %3154 = vst.msk [vmem:[#allocation4] sm:$0xf] %vm3153_vm1, %v3151_v22 }
 0x512   :  { %v3152_v28 = vsel %vm254_vm6, %v2950_v20, %v3148_v24 }
 0x513   :  { %v3163_v12 = vsel %vm3159_vm3, %v3152_v28, %v3162_v25  ;;  %v3168_v18 = vrot.slane %v3152_v28, 1  ;;  %v3174_v63 = vrot.slane %v3152_v28, 2  ;;  %v3158_v11 = vrot.slane %v3152_v28, 7  ;;  %3155 = vst.msk [vmem:[#allocation4 + $0x4] sm:$0xf] %vm3153_vm1, %v3152_v28 }
 0x514   :  { %3164 = vrot.lane.b32.xlu0 %v3163_v12, %s3607_s0  ;;  %s3619_s0 = smov [#allocation4]  }
 0x515   :  { %v3169_v14 = vsel %vm3159_vm3, %v3168_v18, %v3167_v27  ;;  %v3175_v60 = vsel %vm3159_vm3, %v3174_v63, %v3173_v39  ;;  %v3160_v23 = vsel %vm3159_vm3, %v3158_v11, %v3151_v22  ;;  %s3283_s26 = sshll.u32 %s3619_s0, 4  ;;  %s3284_s26 = int_to_ptr.vmem [resolvable:$true] %s3283_s26 }
 0x516   :  { %3170 = vrot.lane.b32.xlu1 %v3169_v14, %s3614_s2  ;;  %s3556_s27 = scalar_lea.vmem %s3284_s26, 128  ;;  %p3561_p1 = scmp.lt.s32.totalorder %s3284_s26, %s3284_s26 }
 0x517   :  { %p3557_p0 = scmp.ne.s32.totalorder %s3284_s26, %s3556_s27  ;;  %p3562_p2 = scmp.lt.s32.totalorder %s3556_s27, %s3556_s27 }
 0x518   :  { %3176 = vrot.lane.b32.xlu0 %v3175_v60, %s3618_s10 }
 0x519   :  { %p3563_p3 = por %p3562_p2, %p3561_p1 }
 0x51b   :  { %p3564_p4 = pnand %p3563_p3, %p3557_p0 }
 0x586   :  { %v3165_v9 = vpop.permute.xlu0 %3164 }
 0x587   :  { %v3179_v29 = vsel %vm4686_vm4, %v3160_v23, %v3165_v9 }
 0x588   :  { %v3171_v30 = vpop.permute.xlu1 %3170 }
 0x589   :  { %v3180_v31 = vsel %vm793_vm15, %v3179_v29, %v3171_v30 }
 0x58a   :  { %v3177_v32 = vpop.permute.xlu0 %3176 }
 0x58b   :  { %v3182_v7 = vsel %vm3181_vm5, %v3180_v31, %v3177_v32 }
 0x58c   :  { %v3183_v33 = vpack.c.bf16 %v3182_v7, %v3182_v7 }
 0x58e   :  { %3482 = vmatmul.mubr.msk.bf16.vlgmr.msra.gmra.mrb[16].mxu0 %vm1698_vm2, %v3183_v33 }
 0x58f   :  { %3567 = shalt.err (!%p3564_p4)
}
 0x590   :  { %s3568_s4 = scalar_lea.hbm %s4682_s13, 128 }
 0x591   :  { %p3569_p5 = scmp.ne.s32.totalorder %s4682_s13, %s3568_s4  ;;  %p3572_p6 = scmp.lt.u32.totalorder %s3568_s4, %s4682_s13 }
 0x593   :  { %p3574_p7 = pnand %p3572_p6, %p3569_p5 }
 0x595   :  { %3577 = shalt.err (!%p3574_p7)
}
 0x596   :  { %3289 = dma.vmem_to_hbm [thread:$0]  %s3284_s26, 128, %s4682_s13, [#allocation5], %s3615_s3, %s3615_s3, %s3605_s30   ;;  %vm3266_vm6 = vcmask 33792  }
 0x597   :  { %v3369_v34 = vld [vmem:[%s4680_s11] ss:$0 sm:$0xff]  ;;  %s3620_s18 = smov [#allocation2]  }
 0x598   :  { %s3274_s19 = sshll.u32 %s3620_s18, 4  ;;  %s3275_s19 = int_to_ptr.vmem [resolvable:$true] %s3274_s19 }
 0x599   :  { %s3578_s20 = scalar_lea.vmem %s3275_s19, 32  ;;  %p3583_p9 = scmp.lt.s32.totalorder %s3275_s19, %s3275_s19 }
 0x59a   :  { %p3579_p8 = scmp.ne.s32.totalorder %s3275_s19, %s3578_s20  ;;  %p3584_p10 = scmp.lt.s32.totalorder %s3578_s20, %s3578_s20 }
 0x59c   :  { %p3585_p11 = por %p3584_p10, %p3583_p9 }
 0x59e   :  { %p3586_p12 = pnand %p3585_p11, %p3579_p8 }
 0x661   :  { %v3260_v51 = vpop.f32.mrb[16].mxu0 }
 0x662   :  { %v3261_v36 = vadd.f32 %v3369_v34, %v3260_v51  ;;  %v3483_v37 = vpop.f32.mrb[17].mxu0 }
 0x663   :  { %v3263_v47 = vpop.f32.mrb[18].mxu0 }
 0x664   :  { %v3484_v6 = vpop.f32.mrb[19].mxu0  ;;  %3267 = vst.msk [vmem:[#allocation2] sm:$0x3] %vm3266_vm6, %v3261_v36 }
 0x665   :  { %3589 = shalt.err (!%p3586_p12)
}
 0x666   :  { %s3590_s11 = scalar_lea.hbm %s4681_s12, 32 }
 0x667   :  { %p3591_p13 = scmp.ne.s32.totalorder %s4681_s12, %s3590_s11  ;;  %p3594_p0 = scmp.lt.u32.totalorder %s3590_s11, %s4681_s12 }
 0x669   :  { %p3596_p1 = pnand %p3594_p0, %p3591_p13 }
 0x66b   :  { %3599 = shalt.err (!%p3596_p1)
}
 0x66c   :  { %3277 = dma.vmem_to_hbm [thread:$0]  %s3275_s19, 32, %s4681_s12, [#allocation3]  }
 0x66d   :  { %3600 = dma.done.wait [#allocation3], 32  }
 0x66e   :  { %3601 = vsyncadd [#allocation3], 4294967264 }
 0x66f   :  { %3602 = dma.done.wait [#allocation5], 128  }
 0x670   :  { %3603 = vsyncadd [#allocation5], 4294967168 }
 0x671   :  { %3296 = vsyncpa [#allocation3], 1 }
 0x672   :  { %3297 = vsyncpa [#allocation5], 1 }

</bundles_post_ra>
